<compile_context>
chip_gen: v6e
topology: v6e:2x2x1
jax: 0.10.0
libtpu: 0.0.40
codegen_flags: <defaults>
</compile_context>

<pallas_src>
from functools import partial

import numpy as np
import jax
import jax.numpy as jnp
from jax import lax
from jax.experimental import pallas as pl
from jax.experimental.pallas import tpu as pltpu

HIDDEN = 64
GATES = 4 * HIDDEN      # 256 — matches v6e/v7x MXU native output width
F_PAD = 128             # lane-dense padded output width


# ----------------------------------------------------------------------------
# Pallas kernel: fused (conv + x->gates) precompute, LSTM recurrence, final FC
# ----------------------------------------------------------------------------
def cnn_lstm_kernel(xp_ref,     # (T*Bp, 2)   im2col windows, row = t*Bp + b
                    wx_ref,     # (2, 256)    fused conv->gate weights [i|f|o|g]
                    bx_ref,     # (1, 256)    fused conv/gate bias     [i|f|o|g]
                    whh_ref,    # (64, 256)   hidden->gate weights     [i|f|o|g]
                    wfc_ref,    # (64, F_PAD) fc weight (transposed, 0-padded)
                    bfc_ref,    # (1, F_PAD)  fc bias (0-padded)
                    out_ref,    # (Bp, F_PAD) output
                    xg_ref):    # (T*Bp, 256) scratch: per-step gate pre-acts
    Bp = out_ref.shape[0]
    TB = xp_ref.shape[0]
    T = TB // Bp

    # Input path hoisted off the recurrence: one matmul for all timesteps.
    # TODO(synk): pass x lane-dense as (Bp, L) and build the two conv taps
    # in-kernel (lane shift / pltpu.roll) to drop the lane-sparse (T*Bp, 2)
    # tile entirely; kept in the standard orientation here for robustness.
    xg_ref[...] = (jnp.dot(xp_ref[...], wx_ref[...],
                           preferred_element_type=jnp.float32)
                   + bx_ref[...])

    whh = whh_ref[...]                                  # hoisted weight load
    # TODO(synk): latch whh in the MXU weight registers across the unrolled
    # recurrence (pltpu.matmul_push_rhs / matmul_acc_lhs / matmul_pop) and/or
    # cast matmul operands to bf16 to cut f32 MXU passes on the serial chain.

    def step(t, carry):
        h, c = carry
        base = pl.multiple_of(t * Bp, Bp)
        xg_t = xg_ref[pl.ds(base, Bp), :]               # (Bp, 256) lane-dense
        gates = xg_t + jnp.dot(h, whh, preferred_element_type=jnp.float32)
        # Packed gate order [i | f | o | g]: one sigmoid over 192 lanes,
        # one tanh over the remaining 64 lanes.
        sig = jax.nn.sigmoid(gates[:, :3 * HIDDEN])
        i_g = sig[:, 0 * HIDDEN:1 * HIDDEN]
        f_g = sig[:, 1 * HIDDEN:2 * HIDDEN]
        o_g = sig[:, 2 * HIDDEN:3 * HIDDEN]
        g_g = jnp.tanh(gates[:, 3 * HIDDEN:4 * HIDDEN])
        c_new = f_g * c + i_g * g_g
        h_new = o_g * jnp.tanh(c_new)
        return h_new, c_new

    h0 = jnp.zeros((Bp, HIDDEN), jnp.float32)
    c0 = jnp.zeros((Bp, HIDDEN), jnp.float32)
    h, _ = lax.fori_loop(0, T, step, (h0, c0), unroll=True)

    # Final linear layer on h_n[-1]; lane-dense (padded) store.
    out_ref[...] = (jnp.dot(h, wfc_ref[...],
                            preferred_element_type=jnp.float32)
                    + bfc_ref[...])


# ----------------------------------------------------------------------------
# One-time parameter fusion (cache the result per weight set).
# ----------------------------------------------------------------------------
def prepare_params(params):
    """Fuse conv->gate weights, reorder gates to [i|f|o|g], pad the FC layer.

    Run once per weight set; pass the result to cnn_lstm_forward on every call.
    """
    wconv, bconv, wih, whh, bg, wfc, bfc = params
    F = wfc.shape[1]
    assert F <= F_PAD, f"forecast_len={F} exceeds F_PAD={F_PAD}"

    order = (0, 1, 3, 2)    # PyTorch gate order [i,f,g,o] -> packed [i,f,o,g]
    wih_cat = jnp.concatenate([wih[g] for g in order], axis=1)   # (32, 256)
    whh_cat = jnp.concatenate([whh[g] for g in order], axis=1)   # (64, 256)
    bg_cat = jnp.concatenate([bg[g] for g in order], axis=1)     # (1, 256)
    wx = wconv @ wih_cat                                         # (2, 256)
    bx = bconv @ wih_cat + bg_cat                                # (1, 256)
    wfc_p = jnp.zeros((HIDDEN, F_PAD), jnp.float32).at[:, :F].set(wfc)
    bfc_p = jnp.zeros((1, F_PAD), jnp.float32).at[:, :F].set(bfc)
    return (wx, bx, whh_cat, wfc_p, bfc_p)


# ----------------------------------------------------------------------------
# Jitted forward: im2col glue + one Pallas call (no per-call param packing).
# ----------------------------------------------------------------------------
@partial(jax.jit, static_argnames=("forecast_len",))
def cnn_lstm_forward(x, prepped, forecast_len):
    """x: (B, 1, L) float32; prepped = prepare_params(...); returns (B, F)."""
    wx, bx, whh_cat, wfc_p, bfc_p = prepped
    B, C_in, L = x.shape
    assert C_in == 1
    T = L - 1                       # conv1d with kernel_size=2, no padding
    Bp = ((B + 7) // 8) * 8         # pad batch to full sublane group

    # im2col for kernel_size=2, batch padded, rows t-major (fused under jit).
    xp = jnp.stack([x[:, 0, :-1], x[:, 0, 1:]], axis=-1)   # (B, T, 2)
    xp = jnp.transpose(xp, (1, 0, 2))                      # (T, B, 2)
    xp = jnp.pad(xp, ((0, 0), (0, Bp - B), (0, 0)))        # (T, Bp, 2)
    xp = xp.reshape(T * Bp, 2)

    vmem = pl.BlockSpec(memory_space=pltpu.MemorySpace.VMEM)
    out = pl.pallas_call(
        cnn_lstm_kernel,
        out_shape=jax.ShapeDtypeStruct((Bp, F_PAD), jnp.float32),
        in_specs=[vmem] * 6,
        out_specs=vmem,
        # xg scratch is T*Bp*GATES*4 bytes (120 KiB here). If L / B scale up,
        # budget it explicitly (pltpu.CompilerParams(vmem_limit_bytes=...))
        # or tile the batch before it exceeds v5e's 16 MiB default scoped VMEM.
        scratch_shapes=[pltpu.VMEM((T * Bp, GATES), jnp.float32)],
    )(xp, wx, bx, whh_cat, wfc_p, bfc_p)
    # TODO(synk): for real batch sizes, add a batch grid axis with
    # dimension_semantics=("parallel",) (2x on v7x's two TensorCores) and
    # size the xg scratch per batch tile; padded rows stay sliced off below.
    return out[:B, :forecast_len]


# ----------------------------------------------------------------------------
# Deterministic parameter initialization (shapes follow the PyTorch module).
# ----------------------------------------------------------------------------
def init_params(key, forecast_len):
    hidden, in_feat = HIDDEN, 32
    k = jax.random.split(key, 8)

    def unif(kk, shape, fan):
        bound = 1.0 / np.sqrt(fan)
        return jax.random.uniform(kk, shape, jnp.float32, -bound, bound)

    # Conv1d(1, 32, kernel_size=2): weight (32, 1, 2), bias (32,)
    w_conv_pt = unif(k[0], (32, 1, 2), 1 * 2)
    b_conv_pt = unif(k[1], (32,), 1 * 2)
    wconv = jnp.transpose(w_conv_pt.reshape(32, 2), (1, 0))      # (2, 32)
    bconv = b_conv_pt.reshape(1, 32)

    # LSTM: W_ih (4*64, 32), W_hh (4*64, 64), b_ih (4*64,), b_hh (4*64,)
    w_ih_pt = unif(k[2], (4 * hidden, in_feat), hidden)
    w_hh_pt = unif(k[3], (4 * hidden, hidden), hidden)
    b_ih_pt = unif(k[4], (4 * hidden,), hidden)
    b_hh_pt = unif(k[5], (4 * hidden,), hidden)
    # per-gate, transposed matrices (PyTorch order i,f,g,o): (4,32,64)/(4,64,64)
    wih = jnp.transpose(w_ih_pt.reshape(4, hidden, in_feat), (0, 2, 1))
    whh = jnp.transpose(w_hh_pt.reshape(4, hidden, hidden), (0, 2, 1))
    bg = (b_ih_pt + b_hh_pt).reshape(4, 1, hidden)

    # Linear(64, forecast_len): weight (F, 64), bias (F,)
    w_fc_pt = unif(k[6], (forecast_len, hidden), hidden)
    b_fc_pt = unif(k[7], (forecast_len,), hidden)
    wfc = jnp.transpose(w_fc_pt, (1, 0))                         # (64, F)
    bfc = b_fc_pt.reshape(1, forecast_len)

    return (wconv, bconv, wih, whh, bg, wfc, bfc)


# ----------------------------------------------------------------------------
# Pure-JAX reference (unfused math, PyTorch gate order, no Pallas).
# ----------------------------------------------------------------------------
def reference_forward(x, params):
    wconv, bconv, wih, whh, bg, wfc, bfc = params
    B, _, L = x.shape
    T = L - 1
    xp = jnp.stack([x[:, 0, :-1], x[:, 0, 1:]], axis=-1)        # (B, T, 2)
    conv = jnp.einsum('btk,ko->bto', xp, wconv) + bconv[None]   # (B, T, 32)

    h = jnp.zeros((B, HIDDEN), jnp.float32)
    c = jnp.zeros((B, HIDDEN), jnp.float32)
    for t in range(T):
        xt = conv[:, t, :]
        gates = [xt @ wih[g] + h @ whh[g] + bg[g] for g in range(4)]
        i_g = jax.nn.sigmoid(gates[0])
        f_g = jax.nn.sigmoid(gates[1])
        g_g = jnp.tanh(gates[2])
        o_g = jax.nn.sigmoid(gates[3])
        c = f_g * c + i_g * g_g
        h = o_g * jnp.tanh(c)
    return h @ wfc + bfc


if __name__ == "__main__":
    B, L = 2, 16            # batch=2, input_len=16
    forecast_len = 12       # one of the PyTorch slider options {3, 6, 12}

    key = jax.random.PRNGKey(0)
    kx, kp = jax.random.split(key)
    x = jax.random.normal(kx, (B, 1, L), jnp.float32)
    params = init_params(kp, forecast_len)

    prepped = prepare_params(params)          # one-time per weight set
    out = cnn_lstm_forward(x, prepped, forecast_len)
    out = jax.block_until_ready(out)

    ref = reference_forward(x, params)
    assert out.shape == (B, forecast_len)
    np.testing.assert_allclose(np.asarray(out), np.asarray(ref),
                               rtol=2e-4, atol=2e-5)
    print("KERNEL_OK")
</pallas_src>

<mosaic_0001>
module attributes {stable_mosaic.version = 11 : i64} {
  func.func @cnn_lstm_kernel(%arg0: memref<120x2xf32, #tpu.memory_space<vmem>>, %arg1: memref<2x256xf32, #tpu.memory_space<vmem>>, %arg2: memref<1x256xf32, #tpu.memory_space<vmem>>, %arg3: memref<64x256xf32, #tpu.memory_space<vmem>>, %arg4: memref<64x128xf32, #tpu.memory_space<vmem>>, %arg5: memref<1x128xf32, #tpu.memory_space<vmem>>, %arg6: memref<8x128xf32, #tpu.memory_space<vmem>>, %arg7: memref<120x256xf32, #tpu.memory_space<vmem>>) attributes {dimension_semantics = [], scalar_prefetch = 0 : i64, scratch_operands = 1 : i64, tpu.core_type = #tpu.core_type<tc>} {
    %c0 = arith.constant 0 : index
    %c0_0 = arith.constant 0 : index
    %0 = vector.load %arg0[%c0, %c0_0] : memref<120x2xf32, #tpu.memory_space<vmem>>, vector<120x2xf32>
    %c0_1 = arith.constant 0 : index
    %c0_2 = arith.constant 0 : index
    %1 = vector.load %arg1[%c0_1, %c0_2] : memref<2x256xf32, #tpu.memory_space<vmem>>, vector<2x256xf32>
    %cst = arith.constant dense<0.000000e+00> : vector<120x256xf32>
    %2 = tpu.matmul %0, %1, %cst {dimension_numbers = #tpu.dot_dimension_numbers<[1], [0], [0], [1], [0, 0, 1, 1], [], []>} : vector<120x2xf32>, vector<2x256xf32>, vector<120x256xf32> -> vector<120x256xf32>
    %c0_3 = arith.constant 0 : index
    %c0_4 = arith.constant 0 : index
    %3 = vector.load %arg2[%c0_3, %c0_4] : memref<1x256xf32, #tpu.memory_space<vmem>>, vector<1x256xf32>
    %4 = vector.broadcast %3 : vector<1x256xf32> to vector<120x256xf32>
    %5 = arith.addf %2, %4 : vector<120x256xf32>
    %c0_5 = arith.constant 0 : index
    %c0_6 = arith.constant 0 : index
    %6 = vector.load %arg7[%c0_5, %c0_6] : memref<120x256xf32, #tpu.memory_space<vmem>>, vector<120x256xf32>
    tpu.vector_store %arg7[%c0_5, %c0_6], %5 {strides = array<i32>} : memref<120x256xf32, #tpu.memory_space<vmem>>, vector<120x256xf32>,
    %c0_7 = arith.constant 0 : index
    %c0_8 = arith.constant 0 : index
    %7 = vector.load %arg3[%c0_7, %c0_8] : memref<64x256xf32, #tpu.memory_space<vmem>>, vector<64x256xf32>
    %cst_9 = arith.constant 0.000000e+00 : f32
    %8 = vector.broadcast %cst_9 : f32 to vector<8x64xf32>
    %cst_10 = arith.constant 0.000000e+00 : f32
    %9 = vector.broadcast %cst_10 : f32 to vector<8x64xf32>
    %c0_i32 = arith.constant 0 : i32
    %c8_i32 = arith.constant 8 : i32
    %10 = arith.muli %c0_i32, %c8_i32 : i32
    %11 = tpu.assume_multiple %10, 8 : i32
    %12 = arith.index_cast %11 : i32 to index
    %c0_11 = arith.constant 0 : index
    %13 = vector.load %arg7[%12, %c0_11] : memref<120x256xf32, #tpu.memory_space<vmem>>, vector<8x256xf32>
    %cst_12 = arith.constant dense<0.000000e+00> : vector<8x256xf32>
    %14 = tpu.matmul %8, %7, %cst_12 {dimension_numbers = #tpu.dot_dimension_numbers<[1], [0], [0], [1], [0, 0, 1, 1], [], []>} : vector<8x64xf32>, vector<64x256xf32>, vector<8x256xf32> -> vector<8x256xf32>
    %15 = arith.addf %13, %14 : vector<8x256xf32>
    %16 = vector.extract_strided_slice %15 {offsets = [0, 0], sizes = [8, 192], strides = [1, 1]} : vector<8x256xf32> to vector<8x192xf32>
    %17 = arith.negf %16 : vector<8x192xf32>
    %18 = math.exp %17 : vector<8x192xf32>
    %cst_13 = arith.constant 1.000000e+00 : f32
    %19 = vector.broadcast %cst_13 : f32 to vector<8x192xf32>
    %20 = arith.addf %19, %18 : vector<8x192xf32>
    %21 = arith.divf %19, %20 : vector<8x192xf32>
    %22 = vector.extract_strided_slice %21 {offsets = [0, 0], sizes = [8, 64], strides = [1, 1]} : vector<8x192xf32> to vector<8x64xf32>
    %23 = vector.extract_strided_slice %21 {offsets = [0, 64], sizes = [8, 64], strides = [1, 1]} : vector<8x192xf32> to vector<8x64xf32>
    %24 = vector.extract_strided_slice %21 {offsets = [0, 128], sizes = [8, 64], strides = [1, 1]} : vector<8x192xf32> to vector<8x64xf32>
    %25 = vector.extract_strided_slice %15 {offsets = [0, 192], sizes = [8, 64], strides = [1, 1]} : vector<8x256xf32> to vector<8x64xf32>
    %26 = math.tanh %25 : vector<8x64xf32>
    %27 = arith.mulf %23, %9 : vector<8x64xf32>
    %28 = arith.mulf %22, %26 : vector<8x64xf32>
    %29 = arith.addf %27, %28 : vector<8x64xf32>
    %30 = math.tanh %29 : vector<8x64xf32>
    %31 = arith.mulf %24, %30 : vector<8x64xf32>
    %c1_i32 = arith.constant 1 : i32
    %c8_i32_14 = arith.constant 8 : i32
    %32 = arith.muli %c1_i32, %c8_i32_14 : i32
    %33 = tpu.assume_multiple %32, 8 : i32
    %34 = arith.index_cast %33 : i32 to index
    %c0_15 = arith.constant 0 : index
    %35 = vector.load %arg7[%34, %c0_15] : memref<120x256xf32, #tpu.memory_space<vmem>>, vector<8x256xf32>
    %cst_16 = arith.constant dense<0.000000e+00> : vector<8x256xf32>
    %36 = tpu.matmul %31, %7, %cst_16 {dimension_numbers = #tpu.dot_dimension_numbers<[1], [0], [0], [1], [0, 0, 1, 1], [], []>} : vector<8x64xf32>, vector<64x256xf32>, vector<8x256xf32> -> vector<8x256xf32>
    %37 = arith.addf %35, %36 : vector<8x256xf32>
    %38 = vector.extract_strided_slice %37 {offsets = [0, 0], sizes = [8, 192], strides = [1, 1]} : vector<8x256xf32> to vector<8x192xf32>
    %39 = arith.negf %38 : vector<8x192xf32>
    %40 = math.exp %39 : vector<8x192xf32>
    %cst_17 = arith.constant 1.000000e+00 : f32
    %41 = vector.broadcast %cst_17 : f32 to vector<8x192xf32>
    %42 = arith.addf %41, %40 : vector<8x192xf32>
    %43 = arith.divf %41, %42 : vector<8x192xf32>
    %44 = vector.extract_strided_slice %43 {offsets = [0, 0], sizes = [8, 64], strides = [1, 1]} : vector<8x192xf32> to vector<8x64xf32>
    %45 = vector.extract_strided_slice %43 {offsets = [0, 64], sizes = [8, 64], strides = [1, 1]} : vector<8x192xf32> to vector<8x64xf32>
    %46 = vector.extract_strided_slice %43 {offsets = [0, 128], sizes = [8, 64], strides = [1, 1]} : vector<8x192xf32> to vector<8x64xf32>
    %47 = vector.extract_strided_slice %37 {offsets = [0, 192], sizes = [8, 64], strides = [1, 1]} : vector<8x256xf32> to vector<8x64xf32>
    %48 = math.tanh %47 : vector<8x64xf32>
    %49 = arith.mulf %45, %29 : vector<8x64xf32>
    %50 = arith.mulf %44, %48 : vector<8x64xf32>
    %51 = arith.addf %49, %50 : vector<8x64xf32>
    %52 = math.tanh %51 : vector<8x64xf32>
    %53 = arith.mulf %46, %52 : vector<8x64xf32>
    %c2_i32 = arith.constant 2 : i32
    %c8_i32_18 = arith.constant 8 : i32
    %54 = arith.muli %c2_i32, %c8_i32_18 : i32
    %55 = tpu.assume_multiple %54, 8 : i32
    %56 = arith.index_cast %55 : i32 to index
    %c0_19 = arith.constant 0 : index
    %57 = vector.load %arg7[%56, %c0_19] : memref<120x256xf32, #tpu.memory_space<vmem>>, vector<8x256xf32>
    %cst_20 = arith.constant dense<0.000000e+00> : vector<8x256xf32>
    %58 = tpu.matmul %53, %7, %cst_20 {dimension_numbers = #tpu.dot_dimension_numbers<[1], [0], [0], [1], [0, 0, 1, 1], [], []>} : vector<8x64xf32>, vector<64x256xf32>, vector<8x256xf32> -> vector<8x256xf32>
    %59 = arith.addf %57, %58 : vector<8x256xf32>
    %60 = vector.extract_strided_slice %59 {offsets = [0, 0], sizes = [8, 192], strides = [1, 1]} : vector<8x256xf32> to vector<8x192xf32>
    %61 = arith.negf %60 : vector<8x192xf32>
    %62 = math.exp %61 : vector<8x192xf32>
    %cst_21 = arith.constant 1.000000e+00 : f32
    %63 = vector.broadcast %cst_21 : f32 to vector<8x192xf32>
    %64 = arith.addf %63, %62 : vector<8x192xf32>
    %65 = arith.divf %63, %64 : vector<8x192xf32>
    %66 = vector.extract_strided_slice %65 {offsets = [0, 0], sizes = [8, 64], strides = [1, 1]} : vector<8x192xf32> to vector<8x64xf32>
    %67 = vector.extract_strided_slice %65 {offsets = [0, 64], sizes = [8, 64], strides = [1, 1]} : vector<8x192xf32> to vector<8x64xf32>
    %68 = vector.extract_strided_slice %65 {offsets = [0, 128], sizes = [8, 64], strides = [1, 1]} : vector<8x192xf32> to vector<8x64xf32>
    %69 = vector.extract_strided_slice %59 {offsets = [0, 192], sizes = [8, 64], strides = [1, 1]} : vector<8x256xf32> to vector<8x64xf32>
    %70 = math.tanh %69 : vector<8x64xf32>
    %71 = arith.mulf %67, %51 : vector<8x64xf32>
    %72 = arith.mulf %66, %70 : vector<8x64xf32>
    %73 = arith.addf %71, %72 : vector<8x64xf32>
    %74 = math.tanh %73 : vector<8x64xf32>
    %75 = arith.mulf %68, %74 : vector<8x64xf32>
    %c3_i32 = arith.constant 3 : i32
    %c8_i32_22 = arith.constant 8 : i32
    %76 = arith.muli %c3_i32, %c8_i32_22 : i32
    %77 = tpu.assume_multiple %76, 8 : i32
    %78 = arith.index_cast %77 : i32 to index
    %c0_23 = arith.constant 0 : index
    %79 = vector.load %arg7[%78, %c0_23] : memref<120x256xf32, #tpu.memory_space<vmem>>, vector<8x256xf32>
    %cst_24 = arith.constant dense<0.000000e+00> : vector<8x256xf32>
    %80 = tpu.matmul %75, %7, %cst_24 {dimension_numbers = #tpu.dot_dimension_numbers<[1], [0], [0], [1], [0, 0, 1, 1], [], []>} : vector<8x64xf32>, vector<64x256xf32>, vector<8x256xf32> -> vector<8x256xf32>
    %81 = arith.addf %79, %80 : vector<8x256xf32>
    %82 = vector.extract_strided_slice %81 {offsets = [0, 0], sizes = [8, 192], strides = [1, 1]} : vector<8x256xf32> to vector<8x192xf32>
    %83 = arith.negf %82 : vector<8x192xf32>
    %84 = math.exp %83 : vector<8x192xf32>
    %cst_25 = arith.constant 1.000000e+00 : f32
    %85 = vector.broadcast %cst_25 : f32 to vector<8x192xf32>
    %86 = arith.addf %85, %84 : vector<8x192xf32>
    %87 = arith.divf %85, %86 : vector<8x192xf32>
    %88 = vector.extract_strided_slice %87 {offsets = [0, 0], sizes = [8, 64], strides = [1, 1]} : vector<8x192xf32> to vector<8x64xf32>
    %89 = vector.extract_strided_slice %87 {offsets = [0, 64], sizes = [8, 64], strides = [1, 1]} : vector<8x192xf32> to vector<8x64xf32>
    %90 = vector.extract_strided_slice %87 {offsets = [0, 128], sizes = [8, 64], strides = [1, 1]} : vector<8x192xf32> to vector<8x64xf32>
    %91 = vector.extract_strided_slice %81 {offsets = [0, 192], sizes = [8, 64], strides = [1, 1]} : vector<8x256xf32> to vector<8x64xf32>
    %92 = math.tanh %91 : vector<8x64xf32>
    %93 = arith.mulf %89, %73 : vector<8x64xf32>
    %94 = arith.mulf %88, %92 : vector<8x64xf32>
    %95 = arith.addf %93, %94 : vector<8x64xf32>
    %96 = math.tanh %95 : vector<8x64xf32>
    %97 = arith.mulf %90, %96 : vector<8x64xf32>
    %c4_i32 = arith.constant 4 : i32
    %c8_i32_26 = arith.constant 8 : i32
    %98 = arith.muli %c4_i32, %c8_i32_26 : i32
    %99 = tpu.assume_multiple %98, 8 : i32
    %100 = arith.index_cast %99 : i32 to index
    %c0_27 = arith.constant 0 : index
    %101 = vector.load %arg7[%100, %c0_27] : memref<120x256xf32, #tpu.memory_space<vmem>>, vector<8x256xf32>
    %cst_28 = arith.constant dense<0.000000e+00> : vector<8x256xf32>
    %102 = tpu.matmul %97, %7, %cst_28 {dimension_numbers = #tpu.dot_dimension_numbers<[1], [0], [0], [1], [0, 0, 1, 1], [], []>} : vector<8x64xf32>, vector<64x256xf32>, vector<8x256xf32> -> vector<8x256xf32>
    %103 = arith.addf %101, %102 : vector<8x256xf32>
    %104 = vector.extract_strided_slice %103 {offsets = [0, 0], sizes = [8, 192], strides = [1, 1]} : vector<8x256xf32> to vector<8x192xf32>
    %105 = arith.negf %104 : vector<8x192xf32>
    %106 = math.exp %105 : vector<8x192xf32>
    %cst_29 = arith.constant 1.000000e+00 : f32
    %107 = vector.broadcast %cst_29 : f32 to vector<8x192xf32>
    %108 = arith.addf %107, %106 : vector<8x192xf32>
    %109 = arith.divf %107, %108 : vector<8x192xf32>
    %110 = vector.extract_strided_slice %109 {offsets = [0, 0], sizes = [8, 64], strides = [1, 1]} : vector<8x192xf32> to vector<8x64xf32>
    %111 = vector.extract_strided_slice %109 {offsets = [0, 64], sizes = [8, 64], strides = [1, 1]} : vector<8x192xf32> to vector<8x64xf32>
    %112 = vector.extract_strided_slice %109 {offsets = [0, 128], sizes = [8, 64], strides = [1, 1]} : vector<8x192xf32> to vector<8x64xf32>
    %113 = vector.extract_strided_slice %103 {offsets = [0, 192], sizes = [8, 64], strides = [1, 1]} : vector<8x256xf32> to vector<8x64xf32>
    %114 = math.tanh %113 : vector<8x64xf32>
    %115 = arith.mulf %111, %95 : vector<8x64xf32>
    %116 = arith.mulf %110, %114 : vector<8x64xf32>
    %117 = arith.addf %115, %116 : vector<8x64xf32>
    %118 = math.tanh %117 : vector<8x64xf32>
    %119 = arith.mulf %112, %118 : vector<8x64xf32>
    %c5_i32 = arith.constant 5 : i32
    %c8_i32_30 = arith.constant 8 : i32
    %120 = arith.muli %c5_i32, %c8_i32_30 : i32
    %121 = tpu.assume_multiple %120, 8 : i32
    %122 = arith.index_cast %121 : i32 to index
    %c0_31 = arith.constant 0 : index
    %123 = vector.load %arg7[%122, %c0_31] : memref<120x256xf32, #tpu.memory_space<vmem>>, vector<8x256xf32>
    %cst_32 = arith.constant dense<0.000000e+00> : vector<8x256xf32>
    %124 = tpu.matmul %119, %7, %cst_32 {dimension_numbers = #tpu.dot_dimension_numbers<[1], [0], [0], [1], [0, 0, 1, 1], [], []>} : vector<8x64xf32>, vector<64x256xf32>, vector<8x256xf32> -> vector<8x256xf32>
    %125 = arith.addf %123, %124 : vector<8x256xf32>
    %126 = vector.extract_strided_slice %125 {offsets = [0, 0], sizes = [8, 192], strides = [1, 1]} : vector<8x256xf32> to vector<8x192xf32>
    %127 = arith.negf %126 : vector<8x192xf32>
    %128 = math.exp %127 : vector<8x192xf32>
    %cst_33 = arith.constant 1.000000e+00 : f32
    %129 = vector.broadcast %cst_33 : f32 to vector<8x192xf32>
    %130 = arith.addf %129, %128 : vector<8x192xf32>
    %131 = arith.divf %129, %130 : vector<8x192xf32>
    %132 = vector.extract_strided_slice %131 {offsets = [0, 0], sizes = [8, 64], strides = [1, 1]} : vector<8x192xf32> to vector<8x64xf32>
    %133 = vector.extract_strided_slice %131 {offsets = [0, 64], sizes = [8, 64], strides = [1, 1]} : vector<8x192xf32> to vector<8x64xf32>
    %134 = vector.extract_strided_slice %131 {offsets = [0, 128], sizes = [8, 64], strides = [1, 1]} : vector<8x192xf32> to vector<8x64xf32>
    %135 = vector.extract_strided_slice %125 {offsets = [0, 192], sizes = [8, 64], strides = [1, 1]} : vector<8x256xf32> to vector<8x64xf32>
    %136 = math.tanh %135 : vector<8x64xf32>
    %137 = arith.mulf %133, %117 : vector<8x64xf32>
    %138 = arith.mulf %132, %136 : vector<8x64xf32>
    %139 = arith.addf %137, %138 : vector<8x64xf32>
    %140 = math.tanh %139 : vector<8x64xf32>
    %141 = arith.mulf %134, %140 : vector<8x64xf32>
    %c6_i32 = arith.constant 6 : i32
    %c8_i32_34 = arith.constant 8 : i32
    %142 = arith.muli %c6_i32, %c8_i32_34 : i32
    %143 = tpu.assume_multiple %142, 8 : i32
    %144 = arith.index_cast %143 : i32 to index
    %c0_35 = arith.constant 0 : index
    %145 = vector.load %arg7[%144, %c0_35] : memref<120x256xf32, #tpu.memory_space<vmem>>, vector<8x256xf32>
    %cst_36 = arith.constant dense<0.000000e+00> : vector<8x256xf32>
    %146 = tpu.matmul %141, %7, %cst_36 {dimension_numbers = #tpu.dot_dimension_numbers<[1], [0], [0], [1], [0, 0, 1, 1], [], []>} : vector<8x64xf32>, vector<64x256xf32>, vector<8x256xf32> -> vector<8x256xf32>
    %147 = arith.addf %145, %146 : vector<8x256xf32>
    %148 = vector.extract_strided_slice %147 {offsets = [0, 0], sizes = [8, 192], strides = [1, 1]} : vector<8x256xf32> to vector<8x192xf32>
    %149 = arith.negf %148 : vector<8x192xf32>
    %150 = math.exp %149 : vector<8x192xf32>
    %cst_37 = arith.constant 1.000000e+00 : f32
    %151 = vector.broadcast %cst_37 : f32 to vector<8x192xf32>
    %152 = arith.addf %151, %150 : vector<8x192xf32>
    %153 = arith.divf %151, %152 : vector<8x192xf32>
    %154 = vector.extract_strided_slice %153 {offsets = [0, 0], sizes = [8, 64], strides = [1, 1]} : vector<8x192xf32> to vector<8x64xf32>
    %155 = vector.extract_strided_slice %153 {offsets = [0, 64], sizes = [8, 64], strides = [1, 1]} : vector<8x192xf32> to vector<8x64xf32>
    %156 = vector.extract_strided_slice %153 {offsets = [0, 128], sizes = [8, 64], strides = [1, 1]} : vector<8x192xf32> to vector<8x64xf32>
    %157 = vector.extract_strided_slice %147 {offsets = [0, 192], sizes = [8, 64], strides = [1, 1]} : vector<8x256xf32> to vector<8x64xf32>
    %158 = math.tanh %157 : vector<8x64xf32>
    %159 = arith.mulf %155, %139 : vector<8x64xf32>
    %160 = arith.mulf %154, %158 : vector<8x64xf32>
    %161 = arith.addf %159, %160 : vector<8x64xf32>
    %162 = math.tanh %161 : vector<8x64xf32>
    %163 = arith.mulf %156, %162 : vector<8x64xf32>
    %c7_i32 = arith.constant 7 : i32
    %c8_i32_38 = arith.constant 8 : i32
    %164 = arith.muli %c7_i32, %c8_i32_38 : i32
    %165 = tpu.assume_multiple %164, 8 : i32
    %166 = arith.index_cast %165 : i32 to index
    %c0_39 = arith.constant 0 : index
    %167 = vector.load %arg7[%166, %c0_39] : memref<120x256xf32, #tpu.memory_space<vmem>>, vector<8x256xf32>
    %cst_40 = arith.constant dense<0.000000e+00> : vector<8x256xf32>
    %168 = tpu.matmul %163, %7, %cst_40 {dimension_numbers = #tpu.dot_dimension_numbers<[1], [0], [0], [1], [0, 0, 1, 1], [], []>} : vector<8x64xf32>, vector<64x256xf32>, vector<8x256xf32> -> vector<8x256xf32>
    %169 = arith.addf %167, %168 : vector<8x256xf32>
    %170 = vector.extract_strided_slice %169 {offsets = [0, 0], sizes = [8, 192], strides = [1, 1]} : vector<8x256xf32> to vector<8x192xf32>
    %171 = arith.negf %170 : vector<8x192xf32>
    %172 = math.exp %171 : vector<8x192xf32>
    %cst_41 = arith.constant 1.000000e+00 : f32
    %173 = vector.broadcast %cst_41 : f32 to vector<8x192xf32>
    %174 = arith.addf %173, %172 : vector<8x192xf32>
    %175 = arith.divf %173, %174 : vector<8x192xf32>
    %176 = vector.extract_strided_slice %175 {offsets = [0, 0], sizes = [8, 64], strides = [1, 1]} : vector<8x192xf32> to vector<8x64xf32>
    %177 = vector.extract_strided_slice %175 {offsets = [0, 64], sizes = [8, 64], strides = [1, 1]} : vector<8x192xf32> to vector<8x64xf32>
    %178 = vector.extract_strided_slice %175 {offsets = [0, 128], sizes = [8, 64], strides = [1, 1]} : vector<8x192xf32> to vector<8x64xf32>
    %179 = vector.extract_strided_slice %169 {offsets = [0, 192], sizes = [8, 64], strides = [1, 1]} : vector<8x256xf32> to vector<8x64xf32>
    %180 = math.tanh %179 : vector<8x64xf32>
    %181 = arith.mulf %177, %161 : vector<8x64xf32>
    %182 = arith.mulf %176, %180 : vector<8x64xf32>
    %183 = arith.addf %181, %182 : vector<8x64xf32>
    %184 = math.tanh %183 : vector<8x64xf32>
    %185 = arith.mulf %178, %184 : vector<8x64xf32>
    %c8_i32_42 = arith.constant 8 : i32
    %c8_i32_43 = arith.constant 8 : i32
    %186 = arith.muli %c8_i32_42, %c8_i32_43 : i32
    %187 = tpu.assume_multiple %186, 8 : i32
    %188 = arith.index_cast %187 : i32 to index
    %c0_44 = arith.constant 0 : index
    %189 = vector.load %arg7[%188, %c0_44] : memref<120x256xf32, #tpu.memory_space<vmem>>, vector<8x256xf32>
    %cst_45 = arith.constant dense<0.000000e+00> : vector<8x256xf32>
    %190 = tpu.matmul %185, %7, %cst_45 {dimension_numbers = #tpu.dot_dimension_numbers<[1], [0], [0], [1], [0, 0, 1, 1], [], []>} : vector<8x64xf32>, vector<64x256xf32>, vector<8x256xf32> -> vector<8x256xf32>
    %191 = arith.addf %189, %190 : vector<8x256xf32>
    %192 = vector.extract_strided_slice %191 {offsets = [0, 0], sizes = [8, 192], strides = [1, 1]} : vector<8x256xf32> to vector<8x192xf32>
    %193 = arith.negf %192 : vector<8x192xf32>
    %194 = math.exp %193 : vector<8x192xf32>
    %cst_46 = arith.constant 1.000000e+00 : f32
    %195 = vector.broadcast %cst_46 : f32 to vector<8x192xf32>
    %196 = arith.addf %195, %194 : vector<8x192xf32>
    %197 = arith.divf %195, %196 : vector<8x192xf32>
    %198 = vector.extract_strided_slice %197 {offsets = [0, 0], sizes = [8, 64], strides = [1, 1]} : vector<8x192xf32> to vector<8x64xf32>
    %199 = vector.extract_strided_slice %197 {offsets = [0, 64], sizes = [8, 64], strides = [1, 1]} : vector<8x192xf32> to vector<8x64xf32>
    %200 = vector.extract_strided_slice %197 {offsets = [0, 128], sizes = [8, 64], strides = [1, 1]} : vector<8x192xf32> to vector<8x64xf32>
    %201 = vector.extract_strided_slice %191 {offsets = [0, 192], sizes = [8, 64], strides = [1, 1]} : vector<8x256xf32> to vector<8x64xf32>
    %202 = math.tanh %201 : vector<8x64xf32>
    %203 = arith.mulf %199, %183 : vector<8x64xf32>
    %204 = arith.mulf %198, %202 : vector<8x64xf32>
    %205 = arith.addf %203, %204 : vector<8x64xf32>
    %206 = math.tanh %205 : vector<8x64xf32>
    %207 = arith.mulf %200, %206 : vector<8x64xf32>
    %c9_i32 = arith.constant 9 : i32
    %c8_i32_47 = arith.constant 8 : i32
    %208 = arith.muli %c9_i32, %c8_i32_47 : i32
    %209 = tpu.assume_multiple %208, 8 : i32
    %210 = arith.index_cast %209 : i32 to index
    %c0_48 = arith.constant 0 : index
    %211 = vector.load %arg7[%210, %c0_48] : memref<120x256xf32, #tpu.memory_space<vmem>>, vector<8x256xf32>
    %cst_49 = arith.constant dense<0.000000e+00> : vector<8x256xf32>
    %212 = tpu.matmul %207, %7, %cst_49 {dimension_numbers = #tpu.dot_dimension_numbers<[1], [0], [0], [1], [0, 0, 1, 1], [], []>} : vector<8x64xf32>, vector<64x256xf32>, vector<8x256xf32> -> vector<8x256xf32>
    %213 = arith.addf %211, %212 : vector<8x256xf32>
    %214 = vector.extract_strided_slice %213 {offsets = [0, 0], sizes = [8, 192], strides = [1, 1]} : vector<8x256xf32> to vector<8x192xf32>
    %215 = arith.negf %214 : vector<8x192xf32>
    %216 = math.exp %215 : vector<8x192xf32>
    %cst_50 = arith.constant 1.000000e+00 : f32
    %217 = vector.broadcast %cst_50 : f32 to vector<8x192xf32>
    %218 = arith.addf %217, %216 : vector<8x192xf32>
    %219 = arith.divf %217, %218 : vector<8x192xf32>
    %220 = vector.extract_strided_slice %219 {offsets = [0, 0], sizes = [8, 64], strides = [1, 1]} : vector<8x192xf32> to vector<8x64xf32>
    %221 = vector.extract_strided_slice %219 {offsets = [0, 64], sizes = [8, 64], strides = [1, 1]} : vector<8x192xf32> to vector<8x64xf32>
    %222 = vector.extract_strided_slice %219 {offsets = [0, 128], sizes = [8, 64], strides = [1, 1]} : vector<8x192xf32> to vector<8x64xf32>
    %223 = vector.extract_strided_slice %213 {offsets = [0, 192], sizes = [8, 64], strides = [1, 1]} : vector<8x256xf32> to vector<8x64xf32>
    %224 = math.tanh %223 : vector<8x64xf32>
    %225 = arith.mulf %221, %205 : vector<8x64xf32>
    %226 = arith.mulf %220, %224 : vector<8x64xf32>
    %227 = arith.addf %225, %226 : vector<8x64xf32>
    %228 = math.tanh %227 : vector<8x64xf32>
    %229 = arith.mulf %222, %228 : vector<8x64xf32>
    %c10_i32 = arith.constant 10 : i32
    %c8_i32_51 = arith.constant 8 : i32
    %230 = arith.muli %c10_i32, %c8_i32_51 : i32
    %231 = tpu.assume_multiple %230, 8 : i32
    %232 = arith.index_cast %231 : i32 to index
    %c0_52 = arith.constant 0 : index
    %233 = vector.load %arg7[%232, %c0_52] : memref<120x256xf32, #tpu.memory_space<vmem>>, vector<8x256xf32>
    %cst_53 = arith.constant dense<0.000000e+00> : vector<8x256xf32>
    %234 = tpu.matmul %229, %7, %cst_53 {dimension_numbers = #tpu.dot_dimension_numbers<[1], [0], [0], [1], [0, 0, 1, 1], [], []>} : vector<8x64xf32>, vector<64x256xf32>, vector<8x256xf32> -> vector<8x256xf32>
    %235 = arith.addf %233, %234 : vector<8x256xf32>
    %236 = vector.extract_strided_slice %235 {offsets = [0, 0], sizes = [8, 192], strides = [1, 1]} : vector<8x256xf32> to vector<8x192xf32>
    %237 = arith.negf %236 : vector<8x192xf32>
    %238 = math.exp %237 : vector<8x192xf32>
    %cst_54 = arith.constant 1.000000e+00 : f32
    %239 = vector.broadcast %cst_54 : f32 to vector<8x192xf32>
    %240 = arith.addf %239, %238 : vector<8x192xf32>
    %241 = arith.divf %239, %240 : vector<8x192xf32>
    %242 = vector.extract_strided_slice %241 {offsets = [0, 0], sizes = [8, 64], strides = [1, 1]} : vector<8x192xf32> to vector<8x64xf32>
    %243 = vector.extract_strided_slice %241 {offsets = [0, 64], sizes = [8, 64], strides = [1, 1]} : vector<8x192xf32> to vector<8x64xf32>
    %244 = vector.extract_strided_slice %241 {offsets = [0, 128], sizes = [8, 64], strides = [1, 1]} : vector<8x192xf32> to vector<8x64xf32>
    %245 = vector.extract_strided_slice %235 {offsets = [0, 192], sizes = [8, 64], strides = [1, 1]} : vector<8x256xf32> to vector<8x64xf32>
    %246 = math.tanh %245 : vector<8x64xf32>
    %247 = arith.mulf %243, %227 : vector<8x64xf32>
    %248 = arith.mulf %242, %246 : vector<8x64xf32>
    %249 = arith.addf %247, %248 : vector<8x64xf32>
    %250 = math.tanh %249 : vector<8x64xf32>
    %251 = arith.mulf %244, %250 : vector<8x64xf32>
    %c11_i32 = arith.constant 11 : i32
    %c8_i32_55 = arith.constant 8 : i32
    %252 = arith.muli %c11_i32, %c8_i32_55 : i32
    %253 = tpu.assume_multiple %252, 8 : i32
    %254 = arith.index_cast %253 : i32 to index
    %c0_56 = arith.constant 0 : index
    %255 = vector.load %arg7[%254, %c0_56] : memref<120x256xf32, #tpu.memory_space<vmem>>, vector<8x256xf32>
    %cst_57 = arith.constant dense<0.000000e+00> : vector<8x256xf32>
    %256 = tpu.matmul %251, %7, %cst_57 {dimension_numbers = #tpu.dot_dimension_numbers<[1], [0], [0], [1], [0, 0, 1, 1], [], []>} : vector<8x64xf32>, vector<64x256xf32>, vector<8x256xf32> -> vector<8x256xf32>
    %257 = arith.addf %255, %256 : vector<8x256xf32>
    %258 = vector.extract_strided_slice %257 {offsets = [0, 0], sizes = [8, 192], strides = [1, 1]} : vector<8x256xf32> to vector<8x192xf32>
    %259 = arith.negf %258 : vector<8x192xf32>
    %260 = math.exp %259 : vector<8x192xf32>
    %cst_58 = arith.constant 1.000000e+00 : f32
    %261 = vector.broadcast %cst_58 : f32 to vector<8x192xf32>
    %262 = arith.addf %261, %260 : vector<8x192xf32>
    %263 = arith.divf %261, %262 : vector<8x192xf32>
    %264 = vector.extract_strided_slice %263 {offsets = [0, 0], sizes = [8, 64], strides = [1, 1]} : vector<8x192xf32> to vector<8x64xf32>
    %265 = vector.extract_strided_slice %263 {offsets = [0, 64], sizes = [8, 64], strides = [1, 1]} : vector<8x192xf32> to vector<8x64xf32>
    %266 = vector.extract_strided_slice %263 {offsets = [0, 128], sizes = [8, 64], strides = [1, 1]} : vector<8x192xf32> to vector<8x64xf32>
    %267 = vector.extract_strided_slice %257 {offsets = [0, 192], sizes = [8, 64], strides = [1, 1]} : vector<8x256xf32> to vector<8x64xf32>
    %268 = math.tanh %267 : vector<8x64xf32>
    %269 = arith.mulf %265, %249 : vector<8x64xf32>
    %270 = arith.mulf %264, %268 : vector<8x64xf32>
    %271 = arith.addf %269, %270 : vector<8x64xf32>
    %272 = math.tanh %271 : vector<8x64xf32>
    %273 = arith.mulf %266, %272 : vector<8x64xf32>
    %c12_i32 = arith.constant 12 : i32
    %c8_i32_59 = arith.constant 8 : i32
    %274 = arith.muli %c12_i32, %c8_i32_59 : i32
    %275 = tpu.assume_multiple %274, 8 : i32
    %276 = arith.index_cast %275 : i32 to index
    %c0_60 = arith.constant 0 : index
    %277 = vector.load %arg7[%276, %c0_60] : memref<120x256xf32, #tpu.memory_space<vmem>>, vector<8x256xf32>
    %cst_61 = arith.constant dense<0.000000e+00> : vector<8x256xf32>
    %278 = tpu.matmul %273, %7, %cst_61 {dimension_numbers = #tpu.dot_dimension_numbers<[1], [0], [0], [1], [0, 0, 1, 1], [], []>} : vector<8x64xf32>, vector<64x256xf32>, vector<8x256xf32> -> vector<8x256xf32>
    %279 = arith.addf %277, %278 : vector<8x256xf32>
    %280 = vector.extract_strided_slice %279 {offsets = [0, 0], sizes = [8, 192], strides = [1, 1]} : vector<8x256xf32> to vector<8x192xf32>
    %281 = arith.negf %280 : vector<8x192xf32>
    %282 = math.exp %281 : vector<8x192xf32>
    %cst_62 = arith.constant 1.000000e+00 : f32
    %283 = vector.broadcast %cst_62 : f32 to vector<8x192xf32>
    %284 = arith.addf %283, %282 : vector<8x192xf32>
    %285 = arith.divf %283, %284 : vector<8x192xf32>
    %286 = vector.extract_strided_slice %285 {offsets = [0, 0], sizes = [8, 64], strides = [1, 1]} : vector<8x192xf32> to vector<8x64xf32>
    %287 = vector.extract_strided_slice %285 {offsets = [0, 64], sizes = [8, 64], strides = [1, 1]} : vector<8x192xf32> to vector<8x64xf32>
    %288 = vector.extract_strided_slice %285 {offsets = [0, 128], sizes = [8, 64], strides = [1, 1]} : vector<8x192xf32> to vector<8x64xf32>
    %289 = vector.extract_strided_slice %279 {offsets = [0, 192], sizes = [8, 64], strides = [1, 1]} : vector<8x256xf32> to vector<8x64xf32>
    %290 = math.tanh %289 : vector<8x64xf32>
    %291 = arith.mulf %287, %271 : vector<8x64xf32>
    %292 = arith.mulf %286, %290 : vector<8x64xf32>
    %293 = arith.addf %291, %292 : vector<8x64xf32>
    %294 = math.tanh %293 : vector<8x64xf32>
    %295 = arith.mulf %288, %294 : vector<8x64xf32>
    %c13_i32 = arith.constant 13 : i32
    %c8_i32_63 = arith.constant 8 : i32
    %296 = arith.muli %c13_i32, %c8_i32_63 : i32
    %297 = tpu.assume_multiple %296, 8 : i32
    %298 = arith.index_cast %297 : i32 to index
    %c0_64 = arith.constant 0 : index
    %299 = vector.load %arg7[%298, %c0_64] : memref<120x256xf32, #tpu.memory_space<vmem>>, vector<8x256xf32>
    %cst_65 = arith.constant dense<0.000000e+00> : vector<8x256xf32>
    %300 = tpu.matmul %295, %7, %cst_65 {dimension_numbers = #tpu.dot_dimension_numbers<[1], [0], [0], [1], [0, 0, 1, 1], [], []>} : vector<8x64xf32>, vector<64x256xf32>, vector<8x256xf32> -> vector<8x256xf32>
    %301 = arith.addf %299, %300 : vector<8x256xf32>
    %302 = vector.extract_strided_slice %301 {offsets = [0, 0], sizes = [8, 192], strides = [1, 1]} : vector<8x256xf32> to vector<8x192xf32>
    %303 = arith.negf %302 : vector<8x192xf32>
    %304 = math.exp %303 : vector<8x192xf32>
    %cst_66 = arith.constant 1.000000e+00 : f32
    %305 = vector.broadcast %cst_66 : f32 to vector<8x192xf32>
    %306 = arith.addf %305, %304 : vector<8x192xf32>
    %307 = arith.divf %305, %306 : vector<8x192xf32>
    %308 = vector.extract_strided_slice %307 {offsets = [0, 0], sizes = [8, 64], strides = [1, 1]} : vector<8x192xf32> to vector<8x64xf32>
    %309 = vector.extract_strided_slice %307 {offsets = [0, 64], sizes = [8, 64], strides = [1, 1]} : vector<8x192xf32> to vector<8x64xf32>
    %310 = vector.extract_strided_slice %307 {offsets = [0, 128], sizes = [8, 64], strides = [1, 1]} : vector<8x192xf32> to vector<8x64xf32>
    %311 = vector.extract_strided_slice %301 {offsets = [0, 192], sizes = [8, 64], strides = [1, 1]} : vector<8x256xf32> to vector<8x64xf32>
    %312 = math.tanh %311 : vector<8x64xf32>
    %313 = arith.mulf %309, %293 : vector<8x64xf32>
    %314 = arith.mulf %308, %312 : vector<8x64xf32>
    %315 = arith.addf %313, %314 : vector<8x64xf32>
    %316 = math.tanh %315 : vector<8x64xf32>
    %317 = arith.mulf %310, %316 : vector<8x64xf32>
    %c14_i32 = arith.constant 14 : i32
    %c8_i32_67 = arith.constant 8 : i32
    %318 = arith.muli %c14_i32, %c8_i32_67 : i32
    %319 = tpu.assume_multiple %318, 8 : i32
    %320 = arith.index_cast %319 : i32 to index
    %c0_68 = arith.constant 0 : index
    %321 = vector.load %arg7[%320, %c0_68] : memref<120x256xf32, #tpu.memory_space<vmem>>, vector<8x256xf32>
    %cst_69 = arith.constant dense<0.000000e+00> : vector<8x256xf32>
    %322 = tpu.matmul %317, %7, %cst_69 {dimension_numbers = #tpu.dot_dimension_numbers<[1], [0], [0], [1], [0, 0, 1, 1], [], []>} : vector<8x64xf32>, vector<64x256xf32>, vector<8x256xf32> -> vector<8x256xf32>
    %323 = arith.addf %321, %322 : vector<8x256xf32>
    %324 = vector.extract_strided_slice %323 {offsets = [0, 0], sizes = [8, 192], strides = [1, 1]} : vector<8x256xf32> to vector<8x192xf32>
    %325 = arith.negf %324 : vector<8x192xf32>
    %326 = math.exp %325 : vector<8x192xf32>
    %cst_70 = arith.constant 1.000000e+00 : f32
    %327 = vector.broadcast %cst_70 : f32 to vector<8x192xf32>
    %328 = arith.addf %327, %326 : vector<8x192xf32>
    %329 = arith.divf %327, %328 : vector<8x192xf32>
    %330 = vector.extract_strided_slice %329 {offsets = [0, 0], sizes = [8, 64], strides = [1, 1]} : vector<8x192xf32> to vector<8x64xf32>
    %331 = vector.extract_strided_slice %329 {offsets = [0, 64], sizes = [8, 64], strides = [1, 1]} : vector<8x192xf32> to vector<8x64xf32>
    %332 = vector.extract_strided_slice %329 {offsets = [0, 128], sizes = [8, 64], strides = [1, 1]} : vector<8x192xf32> to vector<8x64xf32>
    %333 = vector.extract_strided_slice %323 {offsets = [0, 192], sizes = [8, 64], strides = [1, 1]} : vector<8x256xf32> to vector<8x64xf32>
    %334 = math.tanh %333 : vector<8x64xf32>
    %335 = arith.mulf %331, %315 : vector<8x64xf32>
    %336 = arith.mulf %330, %334 : vector<8x64xf32>
    %337 = arith.addf %335, %336 : vector<8x64xf32>
    %338 = math.tanh %337 : vector<8x64xf32>
    %339 = arith.mulf %332, %338 : vector<8x64xf32>
    %c15_i32 = arith.constant 15 : i32
    %c0_71 = arith.constant 0 : index
    %c0_72 = arith.constant 0 : index
    %340 = vector.load %arg4[%c0_71, %c0_72] : memref<64x128xf32, #tpu.memory_space<vmem>>, vector<64x128xf32>
    %cst_73 = arith.constant dense<0.000000e+00> : vector<8x128xf32>
    %341 = tpu.matmul %339, %340, %cst_73 {dimension_numbers = #tpu.dot_dimension_numbers<[1], [0], [0], [1], [0, 0, 1, 1], [], []>} : vector<8x64xf32>, vector<64x128xf32>, vector<8x128xf32> -> vector<8x128xf32>
    %c0_74 = arith.constant 0 : index
    %c0_75 = arith.constant 0 : index
    %342 = vector.load %arg5[%c0_74, %c0_75] : memref<1x128xf32, #tpu.memory_space<vmem>>, vector<1x128xf32>
    %343 = vector.broadcast %342 : vector<1x128xf32> to vector<8x128xf32>
    %344 = arith.addf %341, %343 : vector<8x128xf32>
    %c0_76 = arith.constant 0 : index
    %c0_77 = arith.constant 0 : index
    %345 = vector.load %arg6[%c0_76, %c0_77] : memref<8x128xf32, #tpu.memory_space<vmem>>, vector<8x128xf32>
    tpu.vector_store %arg6[%c0_76, %c0_77], %344 {strides = array<i32>} : memref<8x128xf32, #tpu.memory_space<vmem>>, vector<8x128xf32>,
    return
  }
}

</mosaic_0001>

<bundles_post_ra>
// kernel: cnn_lstm_forward.1
= control target key start
LH: loop header
LB: loop body
LE: loop exit
PB: predicated region body
PF: predicated region fallthrough
CT: control target
= control target key end

     0   :  { %v2376_v3 = vmov 0.0   ;;  %vm106_vm0 = vcmask 1041408   ;;  %vm60_vm1 = vcmask 15360   ;;  %v41_v20 = vlaneseq  ;;  %s2377_s10 = smov 64   ;;  %s3122_s3 = inlined_call_operand.vmem [shape: f32[64,256], index: 3, kind: input, shape index: {}]   ;;  %s3123_s1 = inlined_call_operand.vmem [shape: f32[2,256], index: 1, kind: input, shape index: {}]   ;;  %s3124_s0 = inlined_call_operand.vmem [shape: f32[120,2], index: 0, kind: input, shape index: {}]   ;;  %s3125_s2 = inlined_call_operand.vmem [shape: f32[1,256], index: 2, kind: input, shape index: {}]   ;;  %s3126_s4 = inlined_call_operand.vmem [shape: f32[64,128], index: 4, kind: input, shape index: {}]   ;;  %s3127_s5 = inlined_call_operand.vmem [shape: f32[1,128], index: 5, kind: input, shape index: {}]   ;;  %s3128_s6 = inlined_call_operand.vmem [shape: f32[8,128], index: 6, kind: output, shape index: {}]  }
   0x1   :  { %v2417_v0 = vld [vmem:[%s3122_s3 + $0x78] sm:$0xff]  ;;  %v2422_v1 = vld [vmem:[%s3122_s3 + $0x70] sm:$0xff]  ;;  %v2427_v2 = vld [vmem:[%s3122_s3 + $0x68] sm:$0xff]  ;;  %175 = vmatprep.mubr.f32.mxu0 %v2376_v3  ;;  %385 = vmatprep.mubr.f32.mxu1 %v2376_v3  ;;  %vm317_vm2 = vcmask 523264   ;;  %vm2378_vm3 = vmmov 0  }
   0x2   :  { %337 = vmatprep.subr.mxu1 %v2417_v0  ;;  %v2435_v4 = vld [vmem:[%s3122_s3 + $0x60] sm:$0xff]  ;;  %v2441_v5 = vld [vmem:[%s3122_s3 + $0x58] sm:$0xff]  ;;  %v2447_v6 = vld [vmem:[%s3122_s3 + $0x50] sm:$0xff]  ;;  %v42_v21 = vshrl.u32 %v41_v20, 7 }
   0x3   :  { %338 = vmatpush1.msra.mxu1 %v2422_v1  ;;  %v2085_v7 = vld.sshfl [vmem:[%s3123_s1] sm:$0x33 pattern:$0x76325410]  ;;  %v2456_v8 = vld [vmem:[%s3122_s3 + $0x48] sm:$0xff]  ;;  %v2471_v12 = vld [vmem:[%s3122_s3 + $0x38] sm:$0xff] }
   0x4   :  { %339 = vmatprep.subr.mxu1 %v2427_v2  ;;  %v59_v9 = vcombine.high %v2085_v7, %v2085_v7  ;;  %v2462_v10 = vld [vmem:[%s3122_s3 + $0x40] sm:$0xff]  ;;  %v2477_v13 = vld [vmem:[%s3122_s3 + $0x30] sm:$0xff]  ;;  %v2483_v14 = vld [vmem:[%s3122_s3 + $0x28] sm:$0xff]  ;;  %v43_v22 = vsub.s32 0, %v42_v21  ;;  %v47_v25 = vsub.s32 1, %v42_v21 }
   0x5   :  { %340 = vmatpush1.msra.mxu1 %v2435_v4  ;;  %v23_v11 = vld [vmem:[%s3124_s0] sm:$0xff]  ;;  %v2497_v16 = vld [vmem:[%s3122_s3 + $0x18] sm:$0xff]  ;;  %v2504_v17 = vld [vmem:[%s3122_s3 + $0x10] sm:$0xff] }
   0x6   :  { %341 = vmatprep.subr.mxu1 %v2441_v5  ;;  %2086 = vmatprep.subr.msk.mxu0 %vm106_vm0, %v59_v9  ;;  %v2490_v15 = vld [vmem:[%s3122_s3 + $0x20] sm:$0xff]  ;;  %v2511_v18 = vld [vmem:[%s3122_s3 + $0x8] sm:$0xff]  ;;  %v25_v21 = vld [vmem:[%s3124_s0 + $0x10] sm:$0xff] }
   0x7   :  { %342 = vmatpush1.msra.mxu1 %v2447_v6  ;;  %2087 = vmatpush1.msk.msra.mxu0 %vm106_vm0, %v2085_v7  ;;  %v2518_v19 = vld [vmem:[%s3122_s3] sm:$0xff]  ;;  %v24_v42 = vld [vmem:[%s3124_s0 + $0x8] sm:$0xff] }
   0x8   :  { %343 = vmatprep.subr.mxu1 %v2456_v8  ;;  %2088 = vmatmul.mubr.msk.f32.vlgmr.msra.gmra.mxu0 %vm60_vm1, %v23_v11  ;;  %v39_v23 = vld [vmem:[%s3125_s2] sm:$0x3] }
   0x9   :  { %344 = vmatpush1.msra.mxu1 %v2462_v10  ;;  %181 = vmatprep.mubr.f32.mxu0 %v2376_v3  ;;  %v2559_v24 = vrot.slane %v39_v23, %v43_v22  ;;  %v2562_v28 = vrot.slane %v39_v23, %v47_v25 }
   0xa   :  { %345 = vmatprep.subr.mxu1 %v2471_v12  ;;  %670 = vmatprep.subr.mxu0 %v2417_v0 }
   0xb   :  { %346 = vmatpush1.msra.mxu1 %v2477_v13  ;;  %671 = vmatpush1.msra.mxu0 %v2422_v1 }
   0xc   :  { %347 = vmatprep.subr.mxu1 %v2483_v14  ;;  %672 = vmatprep.subr.mxu0 %v2427_v2 }
   0xd   :  { %348 = vmatpush1.msra.mxu1 %v2490_v15  ;;  %673 = vmatpush1.msra.mxu0 %v2435_v4 }
   0xe   :  { %349 = vmatprep.subr.mxu1 %v2497_v16  ;;  %674 = vmatprep.subr.mxu0 %v2441_v5 }
   0xf   :  { %350 = vmatpush1.msra.mxu1 %v2504_v17  ;;  %675 = vmatpush1.msra.mxu0 %v2447_v6 }
  0x10   :  { %351 = vmatprep.subr.mxu1 %v2511_v18  ;;  %676 = vmatprep.subr.mxu0 %v2456_v8 }
  0x11   :  { %352 = vmatpush1.msra.mxu1 %v2518_v19  ;;  %677 = vmatpush1.msra.mxu0 %v2462_v10 }
  0x12   :  { %386 = vmatmul.mubr.f32.vlgmr.msra.gmra.mxu1 %v2376_v3  ;;  %448 = vmatprep.subr.mxu1 %v2417_v0 }
  0x13   :  { %449 = vmatpush1.msra.mxu1 %v2422_v1  ;;  %496 = vmatprep.mubr.f32.mxu1 %v2376_v3 }
  0x14   :  { %450 = vmatprep.subr.mxu1 %v2427_v2  ;;  %678 = vmatprep.subr.mxu0 %v2471_v12 }
  0x15   :  { %451 = vmatpush1.msra.mxu1 %v2435_v4  ;;  %679 = vmatpush1.msra.mxu0 %v2477_v13 }
  0x16   :  { %452 = vmatprep.subr.mxu1 %v2441_v5  ;;  %680 = vmatprep.subr.mxu0 %v2483_v14 }
  0x17   :  { %453 = vmatpush1.msra.mxu1 %v2447_v6  ;;  %681 = vmatpush1.msra.mxu0 %v2490_v15 }
  0x18   :  { %454 = vmatprep.subr.mxu1 %v2456_v8  ;;  %682 = vmatprep.subr.mxu0 %v2497_v16 }
  0x19   :  { %455 = vmatpush1.msra.mxu1 %v2462_v10  ;;  %683 = vmatpush1.msra.mxu0 %v2504_v17 }
  0x1a   :  { %456 = vmatprep.subr.mxu1 %v2471_v12  ;;  %684 = vmatprep.subr.mxu0 %v2511_v18 }
  0x1b   :  { %457 = vmatpush1.msra.mxu1 %v2477_v13  ;;  %685 = vmatpush1.msra.mxu0 %v2518_v19 }
  0x1c   :  { %458 = vmatprep.subr.mxu1 %v2483_v14  ;;  %892 = vmatprep.subr.mxu0 %v2417_v0 }
  0x1d   :  { %459 = vmatpush1.msra.mxu1 %v2490_v15  ;;  %2089 = vmatmul.mubr.msk.f32.gmra.mxu0 %vm60_vm1, %v24_v42 }
  0x1e   :  { %460 = vmatprep.subr.mxu1 %v2497_v16  ;;  %187 = vmatprep.mubr.f32.mxu0 %v2376_v3 }
  0x1f   :  { %461 = vmatpush1.msra.mxu1 %v2504_v17 }
  0x20   :  { %462 = vmatprep.subr.mxu1 %v2511_v18 }
  0x21   :  { %463 = vmatpush1.msra.mxu1 %v2518_v19  ;;  %2090 = vmatmul.mubr.msk.f32.gmra.mxu0 %vm60_vm1, %v25_v21 }
  0x22   :  { %559 = vmatprep.subr.mxu1 %v2417_v0  ;;  %193 = vmatprep.mubr.f32.mxu0 %v2376_v3 }
  0xc8   :  { %v177_v26 = vpop.f32.mrf.mxu0 }
  0xc9   :  { %v178_v27 = vadd.f32 %v177_v26, %v2559_v24 }
  0xca   :  { %v179_v29 = vpop.f32.mrf.mxu0 }
  0xcb   :  { %v180_v31 = vadd.f32 %v179_v29, %v2562_v28 }
  0xd2   :  { %v387_v30 = vpop.f32.mrf.mxu1 }
  0xd3   :  { %v392_v32 = vadd.f32 %v387_v30, %v178_v27 }
  0xd4   :  { %v389_v33 = vpop.f32.mrf.mxu1 }
  0xd5   :  { %v393_v34 = vadd.f32 %v389_v33, %v180_v31  ;;  %v2103_v36 = vmul.f32 -1.442695, %v392_v32 }
  0xd7   :  { %2180 = vtanh.f32 %v393_v34  ;;  %v2104_v47 = vmul.f32 -1.442695, %v393_v34 }
  0xd8   :  { %2182 = vpow2.f32 %v2103_v36 }
  0xdd   :  { %v183_v53 = vpop.f32.mrf.mxu0 }
  0xde   :  { %v184_v54 = vadd.f32 %v183_v53, %v2559_v24  ;;  %v30_v53 = vld [vmem:[%s3124_s0 + $0x38] sm:$0xff] }
  0xdf   :  { %v185_v55 = vpop.f32.mrf.mxu0 }
  0xe0   :  { %v186_v57 = vadd.f32 %v185_v55, %v2562_v28  ;;  %v32_v55 = vld [vmem:[%s3124_s0 + $0x48] sm:$0xff] }
  0xe1   :  { %v189_v34 = vpop.f32.mrf.mxu0 }
  0xe3   :  { %v191_v36 = vpop.f32.mrf.mxu0 }
  0xe4   :  { %v2181_v35 = vpop.eup %2180 }
  0xe5   :  { %409 = vrot.lane.b32.xlu0 %v2181_v35, %s2377_s10  ;;  %v2183_v37 = vpop.eup %2182  ;;  %v190_v35 = vadd.f32 %v189_v34, %v2559_v24 }
  0xe6   :  { %v400_v38 = vadd.f32 1.0, %v2183_v37 }
  0xe8   :  { %2184 = vrcp.f32 %v400_v38  ;;  %v192_v38 = vadd.f32 %v191_v36, %v2562_v28 }
  0xf5   :  { %v2185_v39 = vpop.eup %2184 }
  0xf6   :  { %v407_v43 = vmul.f32 0.0, %v2185_v39 }
 0x157   :  { %v410_v40 = vpop.permute.xlu0 %409 }
 0x158   :  { %v412_v41 = vmul.f32 %v2185_v39, %v410_v40 }
 0x15a   :  { %414 = vrot.lane.b32.xlu0 %v412_v41, %s2377_s10 }
 0x1cc   :  { %v415_v44 = vpop.permute.xlu0 %414 }
 0x1cd   :  { %v417_v45 = vadd.f32 %v415_v44, %v407_v43 }
 0x1cf   :  { %2186 = vtanh.f32 %v417_v45 }
 0x1d0   :  { %2188 = vpow2.f32 %v2104_v47 }
 0x1dc   :  { %v2187_v46 = vpop.eup %2186 }
 0x1dd   :  { %420 = vrot.lane.b32.xlu1 %v2187_v46, %s2377_s10  ;;  %v2189_v48 = vpop.eup %2188 }
 0x1de   :  { %v401_v49 = vadd.f32 1.0, %v2189_v48 }
 0x1e0   :  { %2190 = vrcp.f32 %v401_v49  ;;  %v26_v49 = vld [vmem:[%s3124_s0 + $0x18] sm:$0xff] }
 0x1e1   :  { %2091 = vmatmul.mubr.msk.f32.gmra.mxu0 %vm60_vm1, %v26_v49 }
 0x1e2   :  { %199 = vmatprep.mubr.f32.mxu0 %v2376_v3 }
 0x1ed   :  { %v2191_v50 = vpop.eup %2190 }
 0x24f   :  { %v421_v51 = vpop.permute.xlu1 %420 }
 0x250   :  { %v423_v52 = vmul.f32 %v2191_v50, %v421_v51  ;;  %v27_v50 = vld [vmem:[%s3124_s0 + $0x20] sm:$0xff]  ;;  %v28_v51 = vld [vmem:[%s3124_s0 + $0x28] sm:$0xff] }
 0x251   :  { %2092 = vmatmul.mubr.msk.f32.gmra.mxu0 %vm60_vm1, %v27_v50 }
 0x252   :  { %2105 = vmatmul.mubr.msk.f32.vlgmr.msra.gmra.mxu1 %vm317_vm2, %v423_v52  ;;  %205 = vmatprep.mubr.f32.mxu0 %v2376_v3  ;;  %v29_v52 = vld [vmem:[%s3124_s0 + $0x30] sm:$0xff] }
 0x253   :  { %560 = vmatpush1.msra.mxu1 %v2422_v1  ;;  %607 = vmatprep.mubr.f32.mxu1 %v2376_v3 }
 0x254   :  { %561 = vmatprep.subr.mxu1 %v2427_v2 }
 0x255   :  { %562 = vmatpush1.msra.mxu1 %v2435_v4  ;;  %2093 = vmatmul.mubr.msk.f32.gmra.mxu0 %vm60_vm1, %v28_v51 }
 0x256   :  { %563 = vmatprep.subr.mxu1 %v2441_v5  ;;  %211 = vmatprep.mubr.f32.mxu0 %v2376_v3 }
 0x257   :  { %564 = vmatpush1.msra.mxu1 %v2447_v6 }
 0x258   :  { %565 = vmatprep.subr.mxu1 %v2456_v8 }
 0x259   :  { %566 = vmatpush1.msra.mxu1 %v2462_v10  ;;  %2094 = vmatmul.mubr.msk.f32.gmra.mxu0 %vm60_vm1, %v29_v52 }
 0x25a   :  { %567 = vmatprep.subr.mxu1 %v2471_v12  ;;  %217 = vmatprep.mubr.f32.mxu0 %v2376_v3 }
 0x25b   :  { %568 = vmatpush1.msra.mxu1 %v2477_v13 }
 0x25c   :  { %569 = vmatprep.subr.mxu1 %v2483_v14 }
 0x25d   :  { %570 = vmatpush1.msra.mxu1 %v2490_v15  ;;  %2095 = vmatmul.mubr.msk.f32.gmra.mxu0 %vm60_vm1, %v30_v53 }
 0x25e   :  { %571 = vmatprep.subr.mxu1 %v2497_v16  ;;  %223 = vmatprep.mubr.f32.mxu0 %v2376_v3 }
 0x25f   :  { %572 = vmatpush1.msra.mxu1 %v2504_v17 }
 0x260   :  { %573 = vmatprep.subr.mxu1 %v2511_v18 }
 0x261   :  { %574 = vmatpush1.msra.mxu1 %v2518_v19 }
 0x262   :  { %781 = vmatprep.subr.mxu1 %v2417_v0 }
 0x312   :  { %v498_v56 = vpop.f32.mrf.mxu1 }
 0x313   :  { %v503_v58 = vadd.f32 %v498_v56, %v184_v54  ;;  %v31_v54 = vld [vmem:[%s3124_s0 + $0x40] sm:$0xff]  ;;  %v33_v56 = vld [vmem:[%s3124_s0 + $0x50] sm:$0xff] }
 0x314   :  { %v500_v59 = vpop.f32.mrf.mxu1  ;;  %2096 = vmatmul.mubr.msk.f32.gmra.mxu0 %vm60_vm1, %v31_v54 }
 0x315   :  { %v504_v60 = vadd.f32 %v500_v59, %v186_v57  ;;  %v2106_v62 = vmul.f32 -1.442695, %v503_v58  ;;  %229 = vmatprep.mubr.f32.mxu0 %v2376_v3  ;;  %v34_v57 = vld [vmem:[%s3124_s0 + $0x58] sm:$0xff]  ;;  %v35_v58 = vld [vmem:[%s3124_s0 + $0x60] sm:$0xff]  ;;  %v36_v59 = vld [vmem:[%s3124_s0 + $0x68] sm:$0xff] }
 0x317   :  { %2192 = vtanh.f32 %v504_v60  ;;  %v2107_v27 = vmul.f32 -1.442695, %v504_v60  ;;  %v37_v60 = vld [vmem:[%s3124_s0 + $0x70] sm:$0xff] }
 0x318   :  { %2194 = vpow2.f32 %v2106_v62  ;;  %2097 = vmatmul.mubr.msk.f32.gmra.mxu0 %vm60_vm1, %v32_v55 }
 0x319   :  { %235 = vmatprep.mubr.f32.mxu0 %v2376_v3 }
 0x31c   :  { %2098 = vmatmul.mubr.msk.f32.gmra.mxu0 %vm60_vm1, %v33_v56 }
 0x31d   :  { %241 = vmatprep.mubr.f32.mxu0 %v2376_v3 }
 0x320   :  { %2099 = vmatmul.mubr.msk.f32.gmra.mxu0 %vm60_vm1, %v34_v57 }
 0x321   :  { %247 = vmatprep.mubr.f32.mxu0 %v2376_v3 }
 0x324   :  { %v2193_v61 = vpop.eup %2192  ;;  %2100 = vmatmul.mubr.msk.f32.gmra.mxu0 %vm60_vm1, %v35_v58 }
 0x325   :  { %520 = vrot.lane.b32.xlu1 %v2193_v61, %s2377_s10  ;;  %v2195_v63 = vpop.eup %2194  ;;  %253 = vmatprep.mubr.f32.mxu0 %v2376_v3 }
 0x326   :  { %v511_v7 = vadd.f32 1.0, %v2195_v63 }
 0x328   :  { %2196 = vrcp.f32 %v511_v7  ;;  %2101 = vmatmul.mubr.msk.f32.gmra.mxu0 %vm60_vm1, %v36_v59 }
 0x329   :  { %259 = vmatprep.mubr.f32.mxu0 %v2376_v3 }
 0x32c   :  { %2102 = vmatmul.mubr.msk.f32.gmra.mxu0 %vm60_vm1, %v37_v60 }
 0x32d   :  { %718 = vmatprep.mubr.f32.mxu0 %v2376_v3 }
 0x335   :  { %v2197_v9 = vpop.eup %2196 }
 0x336   :  { %v518_v22 = vmul.f32 %v2197_v9, %v417_v45 }
 0x397   :  { %v521_v11 = vpop.permute.xlu1 %520 }
 0x398   :  { %v523_v20 = vmul.f32 %v2197_v9, %v521_v11 }
 0x39a   :  { %525 = vrot.lane.b32.xlu0 %v523_v20, %s2377_s10 }
 0x40c   :  { %v526_v23 = vpop.permute.xlu0 %525 }
 0x40d   :  { %v2600_v25 = vadd.f32 %v526_v23, %v518_v22 }
 0x40f   :  { %2198 = vtanh.f32 %v2600_v25 }
 0x410   :  { %2200 = vpow2.f32 %v2107_v27 }
 0x41c   :  { %v2199_v26 = vpop.eup %2198 }
 0x41d   :  { %531 = vrot.lane.b32.xlu1 %v2199_v26, %s2377_s10  ;;  %v2201_v29 = vpop.eup %2200 }
 0x41e   :  { %v512_v30 = vadd.f32 1.0, %v2201_v29 }
 0x420   :  { %2202 = vrcp.f32 %v512_v30 }
 0x42d   :  { %v2203_v31 = vpop.eup %2202 }
 0x48f   :  { %v532_v32 = vpop.permute.xlu1 %531 }
 0x490   :  { %v534_v33 = vmul.f32 %v2203_v31, %v532_v32 }
 0x492   :  { %2108 = vmatmul.mubr.msk.f32.vlgmr.msra.gmra.mxu1 %vm317_vm2, %v534_v33 }
 0x493   :  { %782 = vmatpush1.msra.mxu1 %v2422_v1  ;;  %829 = vmatprep.mubr.f32.mxu1 %v2376_v3 }
 0x494   :  { %783 = vmatprep.subr.mxu1 %v2427_v2 }
 0x495   :  { %784 = vmatpush1.msra.mxu1 %v2435_v4 }
 0x496   :  { %785 = vmatprep.subr.mxu1 %v2441_v5 }
 0x497   :  { %786 = vmatpush1.msra.mxu1 %v2447_v6 }
 0x498   :  { %787 = vmatprep.subr.mxu1 %v2456_v8 }
 0x499   :  { %788 = vmatpush1.msra.mxu1 %v2462_v10 }
 0x49a   :  { %789 = vmatprep.subr.mxu1 %v2471_v12 }
 0x49b   :  { %790 = vmatpush1.msra.mxu1 %v2477_v13 }
 0x49c   :  { %791 = vmatprep.subr.mxu1 %v2483_v14 }
 0x49d   :  { %792 = vmatpush1.msra.mxu1 %v2490_v15 }
 0x49e   :  { %793 = vmatprep.subr.mxu1 %v2497_v16 }
 0x49f   :  { %794 = vmatpush1.msra.mxu1 %v2504_v17 }
 0x4a0   :  { %795 = vmatprep.subr.mxu1 %v2511_v18 }
 0x4a1   :  { %796 = vmatpush1.msra.mxu1 %v2518_v19 }
 0x4a2   :  { %1003 = vmatprep.subr.mxu1 %v2417_v0 }
 0x552   :  { %v609_v37 = vpop.f32.mrf.mxu1 }
 0x553   :  { %v614_v39 = vadd.f32 %v609_v37, %v190_v35 }
 0x554   :  { %v611_v40 = vpop.f32.mrf.mxu1 }
 0x555   :  { %v615_v41 = vadd.f32 %v611_v40, %v192_v38  ;;  %v2109_v43 = vmul.f32 -1.442695, %v614_v39 }
 0x557   :  { %2204 = vtanh.f32 %v615_v41  ;;  %v2110_v9 = vmul.f32 -1.442695, %v615_v41 }
 0x558   :  { %2206 = vpow2.f32 %v2109_v43 }
 0x564   :  { %v2205_v42 = vpop.eup %2204 }
 0x565   :  { %631 = vrot.lane.b32.xlu0 %v2205_v42, %s2377_s10  ;;  %v2207_v44 = vpop.eup %2206 }
 0x566   :  { %v622_v45 = vadd.f32 1.0, %v2207_v44 }
 0x568   :  { %2208 = vrcp.f32 %v622_v45 }
 0x575   :  { %v2209_v46 = vpop.eup %2208 }
 0x576   :  { %v629_v61 = vmul.f32 %v2209_v46, %v2600_v25  ;;  %v195_v25 = vpop.f32.mrf.mxu0 }
 0x577   :  { %v196_v50 = vadd.f32 %v195_v25, %v2559_v24 }
 0x578   :  { %v197_v26 = vpop.f32.mrf.mxu0 }
 0x579   :  { %v198_v52 = vadd.f32 %v197_v26, %v2562_v28 }
 0x57a   :  { %v2709_v27 = vpop.f32.mrf.mxu0 }
 0x57c   :  { %v2711_v29 = vpop.f32.mrf.mxu0 }
 0x57e   :  { %v2713_v30 = vpop.f32.mrf.mxu0 }
 0x580   :  { %v2715_v31 = vpop.f32.mrf.mxu0 }
 0x582   :  { %v2717_v32 = vpop.f32.mrf.mxu0 }
 0x584   :  { %v2719_v33 = vpop.f32.mrf.mxu0 }
 0x586   :  { %v2721_v34 = vpop.f32.mrf.mxu0 }
 0x588   :  { %v2723_v35 = vpop.f32.mrf.mxu0 }
 0x58a   :  { %v2725_v36 = vpop.f32.mrf.mxu0 }
 0x58c   :  { %v2727_v37 = vpop.f32.mrf.mxu0 }
 0x58e   :  { %v2729_v38 = vpop.f32.mrf.mxu0 }
 0x590   :  { %v2731_v39 = vpop.f32.mrf.mxu0 }
 0x592   :  { %v2733_v40 = vpop.f32.mrf.mxu0 }
 0x594   :  { %v2735_v41 = vpop.f32.mrf.mxu0 }
 0x596   :  { %v2737_v42 = vpop.f32.mrf.mxu0 }
 0x598   :  { %v2739_v43 = vpop.f32.mrf.mxu0 }
 0x59a   :  { %v2741_v44 = vpop.f32.mrf.mxu0 }
 0x59c   :  { %v2743_v45 = vpop.f32.mrf.mxu0 }
 0x5d7   :  { %v632_v47 = vpop.permute.xlu0 %631 }
 0x5d8   :  { %v634_v48 = vmul.f32 %v2209_v46, %v632_v47  ;;  %v2745_v46 = vpop.f32.mrf.mxu0 }
 0x5da   :  { %636 = vrot.lane.b32.xlu1 %v634_v48, %s2377_s10  ;;  %v2747_v47 = vpop.f32.mrf.mxu0 }
 0x5dc   :  { %v2749_v48 = vpop.f32.mrf.mxu0 }
 0x5de   :  { %v2751_v49 = vpop.f32.mrf.mxu0 }
 0x64c   :  { %v637_v62 = vpop.permute.xlu1 %636 }
 0x64d   :  { %v2687_v63 = vadd.f32 %v637_v62, %v629_v61 }
 0x64f   :  { %2210 = vtanh.f32 %v2687_v63 }
 0x650   :  { %2212 = vpow2.f32 %v2110_v9 }
 0x65c   :  { %v2211_v7 = vpop.eup %2210 }
 0x65d   :  { %642 = vrot.lane.b32.xlu0 %v2211_v7, %s2377_s10  ;;  %v2213_v11 = vpop.eup %2212 }
 0x65e   :  { %v623_v20 = vadd.f32 1.0, %v2213_v11 }
 0x660   :  { %2214 = vrcp.f32 %v623_v20 }
 0x66d   :  { %v2215_v21 = vpop.eup %2214 }
 0x6cf   :  { %v643_v22 = vpop.permute.xlu0 %642 }
 0x6d0   :  { %v645_v23 = vmul.f32 %v2215_v21, %v643_v22 }
 0x6d2   :  { %2111 = vmatmul.mubr.msk.f32.vlgmr.msra.gmra.mxu0 %vm317_vm2, %v645_v23 }
 0x6d3   :  { %893 = vmatpush1.msra.mxu0 %v2422_v1  ;;  %940 = vmatprep.mubr.f32.mxu0 %v2376_v3 }
 0x6d4   :  { %894 = vmatprep.subr.mxu0 %v2427_v2 }
 0x6d5   :  { %895 = vmatpush1.msra.mxu0 %v2435_v4 }
 0x6d6   :  { %896 = vmatprep.subr.mxu0 %v2441_v5 }
 0x6d7   :  { %897 = vmatpush1.msra.mxu0 %v2447_v6 }
 0x6d8   :  { %898 = vmatprep.subr.mxu0 %v2456_v8 }
 0x6d9   :  { %899 = vmatpush1.msra.mxu0 %v2462_v10 }
 0x6da   :  { %900 = vmatprep.subr.mxu0 %v2471_v12 }
 0x6db   :  { %901 = vmatpush1.msra.mxu0 %v2477_v13 }
 0x6dc   :  { %902 = vmatprep.subr.mxu0 %v2483_v14 }
 0x6dd   :  { %903 = vmatpush1.msra.mxu0 %v2490_v15 }
 0x6de   :  { %904 = vmatprep.subr.mxu0 %v2497_v16 }
 0x6df   :  { %905 = vmatpush1.msra.mxu0 %v2504_v17 }
 0x6e0   :  { %906 = vmatprep.subr.mxu0 %v2511_v18 }
 0x6e1   :  { %907 = vmatpush1.msra.mxu0 %v2518_v19 }
 0x6e2   :  { %1114 = vmatprep.subr.mxu0 %v2417_v0 }
 0x792   :  { %v720_v51 = vpop.f32.mrf.mxu0 }
 0x793   :  { %v725_v53 = vadd.f32 %v720_v51, %v196_v50 }
 0x794   :  { %v722_v54 = vpop.f32.mrf.mxu0 }
 0x795   :  { %v726_v55 = vadd.f32 %v722_v54, %v198_v52  ;;  %v2112_v57 = vmul.f32 -1.442695, %v725_v53  ;;  %v204_v52 = vadd.f32 %v2711_v29, %v2562_v28 }
 0x797   :  { %2216 = vtanh.f32 %v726_v55  ;;  %v2113_v21 = vmul.f32 -1.442695, %v726_v55 }
 0x798   :  { %2218 = vpow2.f32 %v2112_v57 }
 0x7a4   :  { %v2217_v56 = vpop.eup %2216 }
 0x7a5   :  { %742 = vrot.lane.b32.xlu1 %v2217_v56, %s2377_s10  ;;  %v2219_v58 = vpop.eup %2218 }
 0x7a6   :  { %v733_v59 = vadd.f32 1.0, %v2219_v58 }
 0x7a8   :  { %2220 = vrcp.f32 %v733_v59 }
 0x7b5   :  { %v2221_v60 = vpop.eup %2220 }
 0x7b6   :  { %v740_v7 = vmul.f32 %v2221_v60, %v2687_v63  ;;  %v202_v63 = vadd.f32 %v2709_v27, %v2559_v24 }
 0x817   :  { %v743_v61 = vpop.permute.xlu1 %742 }
 0x818   :  { %v745_v62 = vmul.f32 %v2221_v60, %v743_v61 }
 0x81a   :  { %747 = vrot.lane.b32.xlu0 %v745_v62, %s2377_s10 }
 0x88c   :  { %v748_v9 = vpop.permute.xlu0 %747 }
 0x88d   :  { %v750_v11 = vadd.f32 %v748_v9, %v740_v7 }
 0x88f   :  { %2222 = vtanh.f32 %v750_v11 }
 0x890   :  { %2224 = vpow2.f32 %v2113_v21 }
 0x89c   :  { %v2223_v20 = vpop.eup %2222 }
 0x89d   :  { %753 = vrot.lane.b32.xlu1 %v2223_v20, %s2377_s10  ;;  %v2225_v22 = vpop.eup %2224 }
 0x89e   :  { %v734_v23 = vadd.f32 1.0, %v2225_v22 }
 0x8a0   :  { %2226 = vrcp.f32 %v734_v23 }
 0x8ad   :  { %v2227_v25 = vpop.eup %2226 }
 0x90f   :  { %v754_v26 = vpop.permute.xlu1 %753 }
 0x910   :  { %v756_v50 = vmul.f32 %v2227_v25, %v754_v26 }
 0x912   :  { %2114 = vmatmul.mubr.msk.f32.vlgmr.msra.gmra.mxu1 %vm317_vm2, %v756_v50 }
 0x913   :  { %1004 = vmatpush1.msra.mxu1 %v2422_v1  ;;  %1051 = vmatprep.mubr.f32.mxu1 %v2376_v3 }
 0x914   :  { %1005 = vmatprep.subr.mxu1 %v2427_v2 }
 0x915   :  { %1006 = vmatpush1.msra.mxu1 %v2435_v4 }
 0x916   :  { %1007 = vmatprep.subr.mxu1 %v2441_v5 }
 0x917   :  { %1008 = vmatpush1.msra.mxu1 %v2447_v6 }
 0x918   :  { %1009 = vmatprep.subr.mxu1 %v2456_v8 }
 0x919   :  { %1010 = vmatpush1.msra.mxu1 %v2462_v10 }
 0x91a   :  { %1011 = vmatprep.subr.mxu1 %v2471_v12 }
 0x91b   :  { %1012 = vmatpush1.msra.mxu1 %v2477_v13 }
 0x91c   :  { %1013 = vmatprep.subr.mxu1 %v2483_v14 }
 0x91d   :  { %1014 = vmatpush1.msra.mxu1 %v2490_v15 }
 0x91e   :  { %1015 = vmatprep.subr.mxu1 %v2497_v16 }
 0x91f   :  { %1016 = vmatpush1.msra.mxu1 %v2504_v17 }
 0x920   :  { %1017 = vmatprep.subr.mxu1 %v2511_v18 }
 0x921   :  { %1018 = vmatpush1.msra.mxu1 %v2518_v19 }
 0x922   :  { %1225 = vmatprep.subr.mxu1 %v2417_v0 }
 0x9d2   :  { %v831_v51 = vpop.f32.mrf.mxu1 }
 0x9d3   :  { %v836_v53 = vadd.f32 %v831_v51, %v202_v63  ;;  %v210_v63 = vadd.f32 %v2715_v31, %v2562_v28 }
 0x9d4   :  { %v833_v54 = vpop.f32.mrf.mxu1 }
 0x9d5   :  { %v837_v55 = vadd.f32 %v833_v54, %v204_v52  ;;  %v2115_v57 = vmul.f32 -1.442695, %v836_v53 }
 0x9d7   :  { %2228 = vtanh.f32 %v837_v55  ;;  %v2116_v20 = vmul.f32 -1.442695, %v837_v55 }
 0x9d8   :  { %2230 = vpow2.f32 %v2115_v57 }
 0x9e4   :  { %v2229_v56 = vpop.eup %2228 }
 0x9e5   :  { %853 = vrot.lane.b32.xlu0 %v2229_v56, %s2377_s10  ;;  %v2231_v58 = vpop.eup %2230 }
 0x9e6   :  { %v844_v59 = vadd.f32 1.0, %v2231_v58 }
 0x9e8   :  { %2232 = vrcp.f32 %v844_v59 }
 0x9f5   :  { %v2233_v60 = vpop.eup %2232 }
 0x9f6   :  { %v851_v27 = vmul.f32 %v2233_v60, %v750_v11  ;;  %v208_v11 = vadd.f32 %v2713_v30, %v2559_v24 }
 0xa57   :  { %v854_v61 = vpop.permute.xlu0 %853 }
 0xa58   :  { %v856_v62 = vmul.f32 %v2233_v60, %v854_v61 }
 0xa5a   :  { %858 = vrot.lane.b32.xlu1 %v856_v62, %s2377_s10 }
 0xacc   :  { %v859_v7 = vpop.permute.xlu1 %858 }
 0xacd   :  { %v861_v29 = vadd.f32 %v859_v7, %v851_v27 }
 0xacf   :  { %2234 = vtanh.f32 %v861_v29 }
 0xad0   :  { %2236 = vpow2.f32 %v2116_v20 }
 0xadc   :  { %v2235_v9 = vpop.eup %2234 }
 0xadd   :  { %864 = vrot.lane.b32.xlu0 %v2235_v9, %s2377_s10  ;;  %v2237_v21 = vpop.eup %2236 }
 0xade   :  { %v845_v22 = vadd.f32 1.0, %v2237_v21 }
 0xae0   :  { %2238 = vrcp.f32 %v845_v22 }
 0xaed   :  { %v2239_v23 = vpop.eup %2238 }
 0xb4f   :  { %v865_v25 = vpop.permute.xlu0 %864 }
 0xb50   :  { %v867_v26 = vmul.f32 %v2239_v23, %v865_v25  ;;  %v216_v25 = vadd.f32 %v2719_v33, %v2562_v28 }
 0xb52   :  { %2117 = vmatmul.mubr.msk.f32.vlgmr.msra.gmra.mxu0 %vm317_vm2, %v867_v26 }
 0xb53   :  { %1115 = vmatpush1.msra.mxu0 %v2422_v1  ;;  %1162 = vmatprep.mubr.f32.mxu0 %v2376_v3 }
 0xb54   :  { %1116 = vmatprep.subr.mxu0 %v2427_v2 }
 0xb55   :  { %1117 = vmatpush1.msra.mxu0 %v2435_v4 }
 0xb56   :  { %1118 = vmatprep.subr.mxu0 %v2441_v5 }
 0xb57   :  { %1119 = vmatpush1.msra.mxu0 %v2447_v6 }
 0xb58   :  { %1120 = vmatprep.subr.mxu0 %v2456_v8 }
 0xb59   :  { %1121 = vmatpush1.msra.mxu0 %v2462_v10 }
 0xb5a   :  { %1122 = vmatprep.subr.mxu0 %v2471_v12 }
 0xb5b   :  { %1123 = vmatpush1.msra.mxu0 %v2477_v13 }
 0xb5c   :  { %1124 = vmatprep.subr.mxu0 %v2483_v14 }
 0xb5d   :  { %1125 = vmatpush1.msra.mxu0 %v2490_v15 }
 0xb5e   :  { %1126 = vmatprep.subr.mxu0 %v2497_v16 }
 0xb5f   :  { %1127 = vmatpush1.msra.mxu0 %v2504_v17 }
 0xb60   :  { %1128 = vmatprep.subr.mxu0 %v2511_v18 }
 0xb61   :  { %1129 = vmatpush1.msra.mxu0 %v2518_v19 }
 0xb62   :  { %1336 = vmatprep.subr.mxu0 %v2417_v0 }
 0xc12   :  { %v942_v50 = vpop.f32.mrf.mxu0 }
 0xc13   :  { %v947_v51 = vadd.f32 %v942_v50, %v208_v11 }
 0xc14   :  { %v944_v52 = vpop.f32.mrf.mxu0 }
 0xc15   :  { %v948_v53 = vadd.f32 %v944_v52, %v210_v63  ;;  %v2118_v55 = vmul.f32 -1.442695, %v947_v51 }
 0xc17   :  { %2240 = vtanh.f32 %v948_v53  ;;  %v2119_v27 = vmul.f32 -1.442695, %v948_v53 }
 0xc18   :  { %2242 = vpow2.f32 %v2118_v55 }
 0xc24   :  { %v2241_v54 = vpop.eup %2240 }
 0xc25   :  { %964 = vrot.lane.b32.xlu1 %v2241_v54, %s2377_s10  ;;  %v2243_v56 = vpop.eup %2242 }
 0xc26   :  { %v955_v57 = vadd.f32 1.0, %v2243_v56 }
 0xc28   :  { %2244 = vrcp.f32 %v955_v57 }
 0xc35   :  { %v2245_v58 = vpop.eup %2244 }
 0xc36   :  { %v962_v30 = vmul.f32 %v2245_v58, %v861_v29  ;;  %v214_v29 = vadd.f32 %v2717_v32, %v2559_v24 }
 0xc97   :  { %v965_v59 = vpop.permute.xlu1 %964 }
 0xc98   :  { %v967_v60 = vmul.f32 %v2245_v58, %v965_v59 }
 0xc9a   :  { %969 = vrot.lane.b32.xlu0 %v967_v60, %s2377_s10 }
 0xd0c   :  { %v970_v61 = vpop.permute.xlu0 %969 }
 0xd0d   :  { %v972_v31 = vadd.f32 %v970_v61, %v962_v30 }
 0xd0f   :  { %2246 = vtanh.f32 %v972_v31 }
 0xd10   :  { %2248 = vpow2.f32 %v2119_v27 }
 0xd1c   :  { %v2247_v62 = vpop.eup %2246 }
 0xd1d   :  { %975 = vrot.lane.b32.xlu1 %v2247_v62, %s2377_s10  ;;  %v2249_v7 = vpop.eup %2248 }
 0xd1e   :  { %v956_v9 = vadd.f32 1.0, %v2249_v7 }
 0xd20   :  { %2250 = vrcp.f32 %v956_v9 }
 0xd2d   :  { %v2251_v20 = vpop.eup %2250 }
 0xd8f   :  { %v976_v21 = vpop.permute.xlu1 %975 }
 0xd90   :  { %v978_v22 = vmul.f32 %v2251_v20, %v976_v21 }
 0xd92   :  { %2120 = vmatmul.mubr.msk.f32.vlgmr.msra.gmra.mxu1 %vm317_vm2, %v978_v22 }
 0xd93   :  { %1226 = vmatpush1.msra.mxu1 %v2422_v1  ;;  %1273 = vmatprep.mubr.f32.mxu1 %v2376_v3 }
 0xd94   :  { %1227 = vmatprep.subr.mxu1 %v2427_v2 }
 0xd95   :  { %1228 = vmatpush1.msra.mxu1 %v2435_v4 }
 0xd96   :  { %1229 = vmatprep.subr.mxu1 %v2441_v5 }
 0xd97   :  { %1230 = vmatpush1.msra.mxu1 %v2447_v6 }
 0xd98   :  { %1231 = vmatprep.subr.mxu1 %v2456_v8 }
 0xd99   :  { %1232 = vmatpush1.msra.mxu1 %v2462_v10 }
 0xd9a   :  { %1233 = vmatprep.subr.mxu1 %v2471_v12 }
 0xd9b   :  { %1234 = vmatpush1.msra.mxu1 %v2477_v13 }
 0xd9c   :  { %1235 = vmatprep.subr.mxu1 %v2483_v14 }
 0xd9d   :  { %1236 = vmatpush1.msra.mxu1 %v2490_v15 }
 0xd9e   :  { %1237 = vmatprep.subr.mxu1 %v2497_v16 }
 0xd9f   :  { %1238 = vmatpush1.msra.mxu1 %v2504_v17 }
 0xda0   :  { %1239 = vmatprep.subr.mxu1 %v2511_v18 }
 0xda1   :  { %1240 = vmatpush1.msra.mxu1 %v2518_v19 }
 0xda2   :  { %1447 = vmatprep.subr.mxu1 %v2417_v0 }
 0xe52   :  { %v1053_v23 = vpop.f32.mrf.mxu1 }
 0xe53   :  { %v1058_v26 = vadd.f32 %v1053_v23, %v214_v29  ;;  %v2871_v29 = vld [vmem:[%s3122_s3 + $0x70] sm:$0xff]  ;;  %v2878_v23 = vld [vmem:[%s3122_s3 + $0x68] sm:$0xff] }
 0xe54   :  { %v1055_v11 = vpop.f32.mrf.mxu1 }
 0xe55   :  { %v1059_v50 = vadd.f32 %v1055_v11, %v216_v25  ;;  %v2121_v51 = vmul.f32 -1.442695, %v1058_v26  ;;  %v2884_v25 = vld [vmem:[%s3122_s3 + $0x60] sm:$0xff]  ;;  %v2890_v26 = vld [vmem:[%s3122_s3 + $0x58] sm:$0xff]  ;;  %v2896_v11 = vld [vmem:[%s3122_s3 + $0x50] sm:$0xff] }
 0xe57   :  { %2252 = vtanh.f32 %v1059_v50  ;;  %v2122_v58 = vmul.f32 -1.442695, %v1059_v50  ;;  %v2902_v50 = vld [vmem:[%s3122_s3 + $0x48] sm:$0xff] }
 0xe58   :  { %2254 = vpow2.f32 %v2121_v51  ;;  %v2914_v51 = vld [vmem:[%s3122_s3 + $0x38] sm:$0xff] }
 0xe64   :  { %v2253_v63 = vpop.eup %2252 }
 0xe65   :  { %1075 = vrot.lane.b32.xlu0 %v2253_v63, %s2377_s10  ;;  %v2255_v52 = vpop.eup %2254  ;;  %v2908_v63 = vld [vmem:[%s3122_s3 + $0x40] sm:$0xff] }
 0xe66   :  { %v1066_v53 = vadd.f32 1.0, %v2255_v52  ;;  %v2920_v52 = vld [vmem:[%s3122_s3 + $0x30] sm:$0xff] }
 0xe68   :  { %2256 = vrcp.f32 %v1066_v53  ;;  %v2926_v53 = vld [vmem:[%s3122_s3 + $0x28] sm:$0xff] }
 0xe75   :  { %v2257_v0 = vpop.eup %2256 }
 0xe76   :  { %v1073_v32 = vmul.f32 %v2257_v0, %v972_v31 }
 0xed7   :  { %v1076_v54 = vpop.permute.xlu0 %1075 }
 0xed8   :  { %v1078_v55 = vmul.f32 %v2257_v0, %v1076_v54  ;;  %v2932_v0 = vld [vmem:[%s3122_s3 + $0x20] sm:$0xff]  ;;  %v2938_v54 = vld [vmem:[%s3122_s3 + $0x18] sm:$0xff] }
 0xeda   :  { %1080 = vrot.lane.b32.xlu1 %v1078_v55, %s2377_s10  ;;  %v2944_v55 = vld [vmem:[%s3122_s3 + $0x10] sm:$0xff] }
 0xf4c   :  { %v1081_v56 = vpop.permute.xlu1 %1080 }
 0xf4d   :  { %v1083_v33 = vadd.f32 %v1081_v56, %v1073_v32  ;;  %v2950_v32 = vld [vmem:[%s3122_s3 + $0x8] sm:$0xff]  ;;  %v2956_v56 = vld [vmem:[%s3122_s3] sm:$0xff] }
 0xf4f   :  { %2258 = vtanh.f32 %v1083_v33 }
 0xf50   :  { %2260 = vpow2.f32 %v2122_v58  ;;  %v228_v58 = vadd.f32 %v2727_v37, %v2562_v28 }
 0xf5c   :  { %v2259_v57 = vpop.eup %2258 }
 0xf5d   :  { %1086 = vrot.lane.b32.xlu0 %v2259_v57, %s2377_s10  ;;  %v2261_v59 = vpop.eup %2260 }
 0xf5e   :  { %v1067_v60 = vadd.f32 1.0, %v2261_v59 }
 0xf60   :  { %2262 = vrcp.f32 %v1067_v60 }
 0xf6d   :  { %v2263_v30 = vpop.eup %2262 }
 0xfcf   :  { %v1087_v61 = vpop.permute.xlu0 %1086 }
 0xfd0   :  { %v1089_v62 = vmul.f32 %v2263_v30, %v1087_v61 }
 0xfd2   :  { %2123 = vmatmul.mubr.msk.f32.vlgmr.msra.gmra.mxu0 %vm317_vm2, %v1089_v62 }
 0xfd3   :  { %1337 = vmatpush1.msra.mxu0 %v2422_v1  ;;  %1384 = vmatprep.mubr.f32.mxu0 %v2376_v3  ;;  %v2854_v1 = vld [vmem:[%s3122_s3 + $0x78] sm:$0xff] }
 0xfd4   :  { %1338 = vmatprep.subr.mxu0 %v2427_v2  ;;  %v220_v2 = vadd.f32 %v2721_v34, %v2559_v24 }
 0xfd5   :  { %1339 = vmatpush1.msra.mxu0 %v2435_v4 }
 0xfd6   :  { %1340 = vmatprep.subr.mxu0 %v2441_v5  ;;  %v222_v5 = vadd.f32 %v2723_v35, %v2562_v28 }
 0xfd7   :  { %1341 = vmatpush1.msra.mxu0 %v2447_v6 }
 0xfd8   :  { %1342 = vmatprep.subr.mxu0 %v2456_v8 }
 0xfd9   :  { %1343 = vmatpush1.msra.mxu0 %v2462_v10 }
 0xfda   :  { %1344 = vmatprep.subr.mxu0 %v2471_v12 }
 0xfdb   :  { %1345 = vmatpush1.msra.mxu0 %v2477_v13 }
 0xfdc   :  { %1346 = vmatprep.subr.mxu0 %v2483_v14 }
 0xfdd   :  { %1347 = vmatpush1.msra.mxu0 %v2490_v15 }
 0xfde   :  { %1348 = vmatprep.subr.mxu0 %v2497_v16 }
 0xfdf   :  { %1349 = vmatpush1.msra.mxu0 %v2504_v17 }
 0xfe0   :  { %1350 = vmatprep.subr.mxu0 %v2511_v18 }
 0xfe1   :  { %1351 = vmatpush1.msra.mxu0 %v2518_v19 }
 0xfe2   :  { %1558 = vmatprep.subr.mxu0 %v2854_v1 }
0x1092   :  { %v1164_v4 = vpop.f32.mrf.mxu0 }
0x1093   :  { %v1169_v6 = vadd.f32 %v1164_v4, %v220_v2 }
0x1094   :  { %v1166_v8 = vpop.f32.mrf.mxu0 }
0x1095   :  { %v1170_v10 = vadd.f32 %v1166_v8, %v222_v5  ;;  %v2124_v13 = vmul.f32 -1.442695, %v1169_v6 }
0x1097   :  { %2264 = vtanh.f32 %v1170_v10  ;;  %v2125_v27 = vmul.f32 -1.442695, %v1170_v10 }
0x1098   :  { %2266 = vpow2.f32 %v2124_v13 }
0x10a4   :  { %v2265_v12 = vpop.eup %2264 }
0x10a5   :  { %1186 = vrot.lane.b32.xlu1 %v2265_v12, %s2377_s10  ;;  %v2267_v14 = vpop.eup %2266 }
0x10a6   :  { %v1177_v15 = vadd.f32 1.0, %v2267_v14 }
0x10a8   :  { %2268 = vrcp.f32 %v1177_v15 }
0x10b5   :  { %v2269_v16 = vpop.eup %2268 }
0x10b6   :  { %v1184_v19 = vmul.f32 %v2269_v16, %v1083_v33  ;;  %v226_v33 = vadd.f32 %v2725_v36, %v2559_v24 }
0x1117   :  { %v1187_v17 = vpop.permute.xlu1 %1186 }
0x1118   :  { %v1189_v18 = vmul.f32 %v2269_v16, %v1187_v17 }
0x111a   :  { %1191 = vrot.lane.b32.xlu0 %v1189_v18, %s2377_s10 }
0x118c   :  { %v1192_v34 = vpop.permute.xlu0 %1191 }
0x118d   :  { %v2863_v35 = vadd.f32 %v1192_v34, %v1184_v19  ;;  %v232_v19 = vadd.f32 %v2729_v38, %v2559_v24 }
0x118f   :  { %2270 = vtanh.f32 %v2863_v35 }
0x1190   :  { %2272 = vpow2.f32 %v2125_v27 }
0x119c   :  { %v2271_v31 = vpop.eup %2270 }
0x119d   :  { %1197 = vrot.lane.b32.xlu1 %v2271_v31, %s2377_s10  ;;  %v2273_v7 = vpop.eup %2272 }
0x119e   :  { %v1178_v9 = vadd.f32 1.0, %v2273_v7 }
0x11a0   :  { %2274 = vrcp.f32 %v1178_v9 }
0x11ad   :  { %v2275_v20 = vpop.eup %2274 }
0x120f   :  { %v1198_v21 = vpop.permute.xlu1 %1197 }
0x1210   :  { %v1200_v22 = vmul.f32 %v2275_v20, %v1198_v21 }
0x1212   :  { %2126 = vmatmul.mubr.msk.f32.vlgmr.msra.gmra.mxu1 %vm317_vm2, %v1200_v22 }
0x1213   :  { %1448 = vmatpush1.msra.mxu1 %v2871_v29  ;;  %1495 = vmatprep.mubr.f32.mxu1 %v2376_v3 }
0x1214   :  { %1449 = vmatprep.subr.mxu1 %v2878_v23 }
0x1215   :  { %1450 = vmatpush1.msra.mxu1 %v2884_v25 }
0x1216   :  { %1451 = vmatprep.subr.mxu1 %v2890_v26 }
0x1217   :  { %1452 = vmatpush1.msra.mxu1 %v2896_v11 }
0x1218   :  { %1453 = vmatprep.subr.mxu1 %v2902_v50 }
0x1219   :  { %1454 = vmatpush1.msra.mxu1 %v2908_v63 }
0x121a   :  { %1455 = vmatprep.subr.mxu1 %v2914_v51 }
0x121b   :  { %1456 = vmatpush1.msra.mxu1 %v2920_v52 }
0x121c   :  { %1457 = vmatprep.subr.mxu1 %v2926_v53 }
0x121d   :  { %1458 = vmatpush1.msra.mxu1 %v2932_v0 }
0x121e   :  { %1459 = vmatprep.subr.mxu1 %v2938_v54 }
0x121f   :  { %1460 = vmatpush1.msra.mxu1 %v2944_v55 }
0x1220   :  { %1461 = vmatprep.subr.mxu1 %v2950_v32 }
0x1221   :  { %1462 = vmatpush1.msra.mxu1 %v2956_v56 }
0x1222   :  { %1669 = vmatprep.subr.mxu1 %v2854_v1 }
0x12d2   :  { %v1275_v57 = vpop.f32.mrf.mxu1 }
0x12d3   :  { %v1280_v59 = vadd.f32 %v1275_v57, %v226_v33 }
0x12d4   :  { %v1277_v60 = vpop.f32.mrf.mxu1 }
0x12d5   :  { %v1281_v30 = vadd.f32 %v1277_v60, %v228_v58  ;;  %v2127_v62 = vmul.f32 -1.442695, %v1280_v59 }
0x12d7   :  { %2276 = vtanh.f32 %v1281_v30  ;;  %v2128_v13 = vmul.f32 -1.442695, %v1281_v30 }
0x12d8   :  { %2278 = vpow2.f32 %v2127_v62 }
0x12e4   :  { %v2277_v61 = vpop.eup %2276 }
0x12e5   :  { %1297 = vrot.lane.b32.xlu0 %v2277_v61, %s2377_s10  ;;  %v2279_v2 = vpop.eup %2278 }
0x12e6   :  { %v1288_v4 = vadd.f32 1.0, %v2279_v2 }
0x12e8   :  { %2280 = vrcp.f32 %v1288_v4 }
0x12f5   :  { %v2281_v5 = vpop.eup %2280 }
0x12f6   :  { %v1295_v36 = vmul.f32 %v2281_v5, %v2863_v35  ;;  %v234_v35 = vadd.f32 %v2731_v39, %v2562_v28 }
0x1357   :  { %v1298_v6 = vpop.permute.xlu0 %1297 }
0x1358   :  { %v1300_v8 = vmul.f32 %v2281_v5, %v1298_v6  ;;  %v238_v6 = vadd.f32 %v2733_v40, %v2559_v24 }
0x135a   :  { %1302 = vrot.lane.b32.xlu1 %v1300_v8, %s2377_s10 }
0x13cc   :  { %v1303_v37 = vpop.permute.xlu1 %1302 }
0x13cd   :  { %v1305_v10 = vadd.f32 %v1303_v37, %v1295_v36  ;;  %v240_v36 = vadd.f32 %v2735_v41, %v2562_v28 }
0x13cf   :  { %2282 = vtanh.f32 %v1305_v10 }
0x13d0   :  { %2284 = vpow2.f32 %v2128_v13 }
0x13dc   :  { %v2283_v12 = vpop.eup %2282 }
0x13dd   :  { %1308 = vrot.lane.b32.xlu0 %v2283_v12, %s2377_s10  ;;  %v2285_v14 = vpop.eup %2284 }
0x13de   :  { %v1289_v15 = vadd.f32 1.0, %v2285_v14 }
0x13e0   :  { %2286 = vrcp.f32 %v1289_v15 }
0x13ed   :  { %v2287_v16 = vpop.eup %2286 }
0x144f   :  { %v1309_v17 = vpop.permute.xlu0 %1308 }
0x1450   :  { %v1311_v18 = vmul.f32 %v2287_v16, %v1309_v17 }
0x1452   :  { %2129 = vmatmul.mubr.msk.f32.vlgmr.msra.gmra.mxu0 %vm317_vm2, %v1311_v18 }
0x1453   :  { %1559 = vmatpush1.msra.mxu0 %v2871_v29  ;;  %1606 = vmatprep.mubr.f32.mxu0 %v2376_v3 }
0x1454   :  { %1560 = vmatprep.subr.mxu0 %v2878_v23 }
0x1455   :  { %1561 = vmatpush1.msra.mxu0 %v2884_v25 }
0x1456   :  { %1562 = vmatprep.subr.mxu0 %v2890_v26 }
0x1457   :  { %1563 = vmatpush1.msra.mxu0 %v2896_v11 }
0x1458   :  { %1564 = vmatprep.subr.mxu0 %v2902_v50 }
0x1459   :  { %1565 = vmatpush1.msra.mxu0 %v2908_v63 }
0x145a   :  { %1566 = vmatprep.subr.mxu0 %v2914_v51 }
0x145b   :  { %1567 = vmatpush1.msra.mxu0 %v2920_v52 }
0x145c   :  { %1568 = vmatprep.subr.mxu0 %v2926_v53 }
0x145d   :  { %1569 = vmatpush1.msra.mxu0 %v2932_v0 }
0x145e   :  { %1570 = vmatprep.subr.mxu0 %v2938_v54 }
0x145f   :  { %1571 = vmatpush1.msra.mxu0 %v2944_v55 }
0x1460   :  { %1572 = vmatprep.subr.mxu0 %v2950_v32 }
0x1461   :  { %1573 = vmatpush1.msra.mxu0 %v2956_v56 }
0x1462   :  { %1780 = vmatprep.subr.mxu0 %v2854_v1 }
0x1512   :  { %v1386_v34 = vpop.f32.mrf.mxu0 }
0x1513   :  { %v1391_v31 = vadd.f32 %v1386_v34, %v232_v19 }
0x1514   :  { %v1388_v27 = vpop.f32.mrf.mxu0 }
0x1515   :  { %v1392_v7 = vadd.f32 %v1388_v27, %v234_v35  ;;  %v2130_v20 = vmul.f32 -1.442695, %v1391_v31 }
0x1517   :  { %2288 = vtanh.f32 %v1392_v7  ;;  %v2131_v30 = vmul.f32 -1.442695, %v1392_v7 }
0x1518   :  { %2290 = vpow2.f32 %v2130_v20 }
0x1524   :  { %v2289_v9 = vpop.eup %2288 }
0x1525   :  { %1408 = vrot.lane.b32.xlu1 %v2289_v9, %s2377_s10  ;;  %v2291_v21 = vpop.eup %2290 }
0x1526   :  { %v1399_v22 = vadd.f32 1.0, %v2291_v21  ;;  %v244_v21 = vadd.f32 %v2737_v42, %v2559_v24 }
0x1528   :  { %2292 = vrcp.f32 %v1399_v22 }
0x1535   :  { %v2293_v33 = vpop.eup %2292 }
0x1536   :  { %v1406_v38 = vmul.f32 %v2293_v33, %v1305_v10 }
0x1597   :  { %v1409_v57 = vpop.permute.xlu1 %1408 }
0x1598   :  { %v1411_v58 = vmul.f32 %v2293_v33, %v1409_v57  ;;  %v246_v33 = vadd.f32 %v2739_v43, %v2562_v28 }
0x159a   :  { %1413 = vrot.lane.b32.xlu0 %v1411_v58, %s2377_s10 }
0x160c   :  { %v1414_v59 = vpop.permute.xlu0 %1413 }
0x160d   :  { %v1416_v39 = vadd.f32 %v1414_v59, %v1406_v38 }
0x160f   :  { %2294 = vtanh.f32 %v1416_v39 }
0x1610   :  { %2296 = vpow2.f32 %v2131_v30 }
0x161c   :  { %v2295_v60 = vpop.eup %2294 }
0x161d   :  { %1419 = vrot.lane.b32.xlu1 %v2295_v60, %s2377_s10  ;;  %v2297_v61 = vpop.eup %2296 }
0x161e   :  { %v1400_v62 = vadd.f32 1.0, %v2297_v61 }
0x1620   :  { %2298 = vrcp.f32 %v1400_v62 }
0x162d   :  { %v2299_v2 = vpop.eup %2298 }
0x168f   :  { %v1420_v4 = vpop.permute.xlu1 %1419 }
0x1690   :  { %v1422_v5 = vmul.f32 %v2299_v2, %v1420_v4 }
0x1692   :  { %2132 = vmatmul.mubr.msk.f32.vlgmr.msra.gmra.mxu1 %vm317_vm2, %v1422_v5 }
0x1693   :  { %1670 = vmatpush1.msra.mxu1 %v2871_v29  ;;  %1717 = vmatprep.mubr.f32.mxu1 %v2376_v3 }
0x1694   :  { %1671 = vmatprep.subr.mxu1 %v2878_v23 }
0x1695   :  { %1672 = vmatpush1.msra.mxu1 %v2884_v25 }
0x1696   :  { %1673 = vmatprep.subr.mxu1 %v2890_v26 }
0x1697   :  { %1674 = vmatpush1.msra.mxu1 %v2896_v11 }
0x1698   :  { %1675 = vmatprep.subr.mxu1 %v2902_v50 }
0x1699   :  { %1676 = vmatpush1.msra.mxu1 %v2908_v63 }
0x169a   :  { %1677 = vmatprep.subr.mxu1 %v2914_v51 }
0x169b   :  { %1678 = vmatpush1.msra.mxu1 %v2920_v52 }
0x169c   :  { %1679 = vmatprep.subr.mxu1 %v2926_v53 }
0x169d   :  { %1680 = vmatpush1.msra.mxu1 %v2932_v0 }
0x169e   :  { %1681 = vmatprep.subr.mxu1 %v2938_v54 }
0x169f   :  { %1682 = vmatpush1.msra.mxu1 %v2944_v55 }
0x16a0   :  { %1683 = vmatprep.subr.mxu1 %v2950_v32 }
0x16a1   :  { %1684 = vmatpush1.msra.mxu1 %v2956_v56 }
0x16a2   :  { %1891 = vmatprep.subr.mxu1 %v2854_v1 }
0x1752   :  { %v1497_v8 = vpop.f32.mrf.mxu1 }
0x1753   :  { %v1502_v37 = vadd.f32 %v1497_v8, %v238_v6 }
0x1754   :  { %v1499_v10 = vpop.f32.mrf.mxu1 }
0x1755   :  { %v1503_v12 = vadd.f32 %v1499_v10, %v240_v36  ;;  %v2133_v14 = vmul.f32 -1.442695, %v1502_v37 }
0x1757   :  { %2300 = vtanh.f32 %v1503_v12  ;;  %v2134_v35 = vmul.f32 -1.442695, %v1503_v12 }
0x1758   :  { %2302 = vpow2.f32 %v2133_v14 }
0x1764   :  { %v2301_v13 = vpop.eup %2300 }
0x1765   :  { %1519 = vrot.lane.b32.xlu0 %v2301_v13, %s2377_s10  ;;  %v2303_v15 = vpop.eup %2302 }
0x1766   :  { %v1510_v16 = vadd.f32 1.0, %v2303_v15 }
0x1768   :  { %2304 = vrcp.f32 %v1510_v16 }
0x1775   :  { %v2305_v1 = vpop.eup %2304 }
0x1776   :  { %v1517_v40 = vmul.f32 %v2305_v1, %v1416_v39 }
0x17d7   :  { %v1520_v17 = vpop.permute.xlu0 %1519 }
0x17d8   :  { %v1522_v18 = vmul.f32 %v2305_v1, %v1520_v17 }
0x17da   :  { %1524 = vrot.lane.b32.xlu1 %v1522_v18, %s2377_s10  ;;  %v256_v18 = vadd.f32 %v2745_v46, %v2559_v24 }
0x184c   :  { %v1525_v19 = vpop.permute.xlu1 %1524 }
0x184d   :  { %v1527_v41 = vadd.f32 %v1525_v19, %v1517_v40  ;;  %v258_v19 = vadd.f32 %v2747_v47, %v2562_v28 }
0x184f   :  { %2306 = vtanh.f32 %v1527_v41 }
0x1850   :  { %2308 = vpow2.f32 %v2134_v35 }
0x185c   :  { %v2307_v34 = vpop.eup %2306 }
0x185d   :  { %1530 = vrot.lane.b32.xlu0 %v2307_v34, %s2377_s10  ;;  %v2309_v31 = vpop.eup %2308 }
0x185e   :  { %v1511_v27 = vadd.f32 1.0, %v2309_v31 }
0x1860   :  { %2310 = vrcp.f32 %v1511_v27 }
0x186d   :  { %v2311_v7 = vpop.eup %2310 }
0x18cf   :  { %v1531_v9 = vpop.permute.xlu0 %1530 }
0x18d0   :  { %v1533_v20 = vmul.f32 %v2311_v7, %v1531_v9 }
0x18d2   :  { %2135 = vmatmul.mubr.msk.f32.vlgmr.msra.gmra.mxu0 %vm317_vm2, %v1533_v20 }
0x18d3   :  { %1781 = vmatpush1.msra.mxu0 %v2871_v29  ;;  %1828 = vmatprep.mubr.f32.mxu0 %v2376_v3 }
0x18d4   :  { %1782 = vmatprep.subr.mxu0 %v2878_v23 }
0x18d5   :  { %1783 = vmatpush1.msra.mxu0 %v2884_v25 }
0x18d6   :  { %1784 = vmatprep.subr.mxu0 %v2890_v26 }
0x18d7   :  { %1785 = vmatpush1.msra.mxu0 %v2896_v11 }
0x18d8   :  { %1786 = vmatprep.subr.mxu0 %v2902_v50 }
0x18d9   :  { %1787 = vmatpush1.msra.mxu0 %v2908_v63 }
0x18da   :  { %1788 = vmatprep.subr.mxu0 %v2914_v51 }
0x18db   :  { %1789 = vmatpush1.msra.mxu0 %v2920_v52 }
0x18dc   :  { %1790 = vmatprep.subr.mxu0 %v2926_v53 }
0x18dd   :  { %1791 = vmatpush1.msra.mxu0 %v2932_v0 }
0x18de   :  { %1792 = vmatprep.subr.mxu0 %v2938_v54 }
0x18df   :  { %1793 = vmatpush1.msra.mxu0 %v2944_v55 }
0x18e0   :  { %1794 = vmatprep.subr.mxu0 %v2950_v32 }
0x18e1   :  { %1795 = vmatpush1.msra.mxu0 %v2956_v56 }
0x18e2   :  { %2158 = vmatprep.subr.mxu0 %v2376_v3 }
0x1992   :  { %v1608_v22 = vpop.f32.mrf.mxu0 }
0x1993   :  { %v1613_v57 = vadd.f32 %v1608_v22, %v244_v21 }
0x1994   :  { %v1610_v58 = vpop.f32.mrf.mxu0 }
0x1995   :  { %v1614_v38 = vadd.f32 %v1610_v58, %v246_v33  ;;  %v2136_v39 = vmul.f32 -1.442695, %v1613_v57 }
0x1997   :  { %2312 = vtanh.f32 %v1614_v38  ;;  %v2137_v6 = vmul.f32 -1.442695, %v1614_v38 }
0x1998   :  { %2314 = vpow2.f32 %v2136_v39 }
0x19a4   :  { %v2313_v59 = vpop.eup %2312 }
0x19a5   :  { %1630 = vrot.lane.b32.xlu1 %v2313_v59, %s2377_s10  ;;  %v2315_v60 = vpop.eup %2314 }
0x19a6   :  { %v1621_v30 = vadd.f32 1.0, %v2315_v60 }
0x19a8   :  { %2316 = vrcp.f32 %v1621_v30 }
0x19b5   :  { %v2317_v61 = vpop.eup %2316 }
0x19b6   :  { %v1628_v42 = vmul.f32 %v2317_v61, %v1527_v41 }
0x1a17   :  { %v1631_v62 = vpop.permute.xlu1 %1630 }
0x1a18   :  { %v1633_v2 = vmul.f32 %v2317_v61, %v1631_v62  ;;  %v262_v61 = vadd.f32 %v2749_v48, %v2559_v24  ;;  %v1983_v48 = vld [vmem:[%s3126_s4 + $0x28] sm:$0xff] }
0x1a1a   :  { %1635 = vrot.lane.b32.xlu0 %v1633_v2, %s2377_s10  ;;  %v264_v2 = vadd.f32 %v2751_v49, %v2562_v28  ;;  %v1982_v49 = vld [vmem:[%s3126_s4 + $0x20] sm:$0xff] }
0x1a8c   :  { %v1636_v4 = vpop.permute.xlu0 %1635 }
0x1a8d   :  { %v1638_v43 = vadd.f32 %v1636_v4, %v1628_v42 }
0x1a8f   :  { %2318 = vtanh.f32 %v1638_v43 }
0x1a90   :  { %2320 = vpow2.f32 %v2137_v6 }
0x1a9c   :  { %v2319_v5 = vpop.eup %2318 }
0x1a9d   :  { %1641 = vrot.lane.b32.xlu1 %v2319_v5, %s2377_s10  ;;  %v2321_v8 = vpop.eup %2320 }
0x1a9e   :  { %v1622_v36 = vadd.f32 1.0, %v2321_v8 }
0x1aa0   :  { %2322 = vrcp.f32 %v1622_v36 }
0x1aad   :  { %v2323_v37 = vpop.eup %2322 }
0x1b0f   :  { %v1642_v10 = vpop.permute.xlu1 %1641 }
0x1b10   :  { %v1644_v12 = vmul.f32 %v2323_v37, %v1642_v10 }
0x1b12   :  { %2138 = vmatmul.mubr.msk.f32.vlgmr.msra.gmra.mxu1 %vm317_vm2, %v1644_v12 }
0x1b13   :  { %1892 = vmatpush1.msra.mxu1 %v2871_v29  ;;  %1939 = vmatprep.mubr.f32.mxu1 %v2376_v3  ;;  %v250_v29 = vadd.f32 %v2741_v44, %v2559_v24  ;;  %v1985_v24 = vld [vmem:[%s3126_s4 + $0x38] sm:$0xff] }
0x1b14   :  { %1893 = vmatprep.subr.mxu1 %v2878_v23 }
0x1b15   :  { %1894 = vmatpush1.msra.mxu1 %v2884_v25  ;;  %v252_v25 = vadd.f32 %v2743_v45, %v2562_v28  ;;  %v1984_v28 = vld [vmem:[%s3126_s4 + $0x30] sm:$0xff] }
0x1b16   :  { %1895 = vmatprep.subr.mxu1 %v2890_v26 }
0x1b17   :  { %1896 = vmatpush1.msra.mxu1 %v2896_v11 }
0x1b18   :  { %1897 = vmatprep.subr.mxu1 %v2902_v50 }
0x1b19   :  { %1898 = vmatpush1.msra.mxu1 %v2908_v63 }
0x1b1a   :  { %1899 = vmatprep.subr.mxu1 %v2914_v51 }
0x1b1b   :  { %1900 = vmatpush1.msra.mxu1 %v2920_v52 }
0x1b1c   :  { %1901 = vmatprep.subr.mxu1 %v2926_v53 }
0x1b1d   :  { %1902 = vmatpush1.msra.mxu1 %v2932_v0 }
0x1b1e   :  { %1903 = vmatprep.subr.mxu1 %v2938_v54 }
0x1b1f   :  { %1904 = vmatpush1.msra.mxu1 %v2944_v55 }
0x1b20   :  { %1905 = vmatprep.subr.mxu1 %v2950_v32 }
0x1b21   :  { %1906 = vmatpush1.msra.mxu1 %v2956_v56 }
0x1bd2   :  { %v1719_v23 = vpop.f32.mrf.mxu1 }
0x1bd3   :  { %v1724_v26 = vadd.f32 %v1719_v23, %v250_v29  ;;  %v1981_v29 = vld [vmem:[%s3126_s4 + $0x18] sm:$0xff]  ;;  %v1980_v23 = vld [vmem:[%s3126_s4 + $0x10] sm:$0xff] }
0x1bd4   :  { %v1721_v11 = vpop.f32.mrf.mxu1 }
0x1bd5   :  { %v1725_v50 = vadd.f32 %v1721_v11, %v252_v25  ;;  %v2139_v51 = vmul.f32 -1.442695, %v1724_v26  ;;  %v1979_v25 = vld [vmem:[%s3126_s4 + $0x8] sm:$0xff] }
0x1bd7   :  { %2324 = vtanh.f32 %v1725_v50  ;;  %v2140_v13 = vmul.f32 -1.442695, %v1725_v50 }
0x1bd8   :  { %2326 = vpow2.f32 %v2139_v51 }
0x1be4   :  { %v2325_v63 = vpop.eup %2324 }
0x1be5   :  { %1741 = vrot.lane.b32.xlu0 %v2325_v63, %s2377_s10  ;;  %v2327_v52 = vpop.eup %2326  ;;  %v1978_v63 = vld [vmem:[%s3126_s4] sm:$0xff] }
0x1be6   :  { %v1732_v53 = vadd.f32 1.0, %v2327_v52 }
0x1be8   :  { %2328 = vrcp.f32 %v1732_v53 }
0x1bf5   :  { %v2329_v0 = vpop.eup %2328 }
0x1bf6   :  { %v1739_v44 = vmul.f32 %v2329_v0, %v1638_v43 }
0x1c57   :  { %v1742_v54 = vpop.permute.xlu0 %1741 }
0x1c58   :  { %v1744_v55 = vmul.f32 %v2329_v0, %v1742_v54 }
0x1c5a   :  { %1746 = vrot.lane.b32.xlu1 %v1744_v55, %s2377_s10 }
0x1ccc   :  { %v1747_v32 = vpop.permute.xlu1 %1746 }
0x1ccd   :  { %v1749_v45 = vadd.f32 %v1747_v32, %v1739_v44  ;;  %v2147_v32 = vld [vmem:[%s3127_s5] ss:$0 sm:$0xff] }
0x1ccf   :  { %2330 = vtanh.f32 %v1749_v45 }
0x1cd0   :  { %2332 = vpow2.f32 %v2140_v13 }
0x1cdc   :  { %v2331_v56 = vpop.eup %2330 }
0x1cdd   :  { %1752 = vrot.lane.b32.xlu0 %v2331_v56, %s2377_s10  ;;  %v2333_v14 = vpop.eup %2332 }
0x1cde   :  { %v1733_v15 = vadd.f32 1.0, %v2333_v14 }
0x1ce0   :  { %2334 = vrcp.f32 %v1733_v15 }
0x1ced   :  { %v2335_v16 = vpop.eup %2334 }
0x1d4f   :  { %v1753_v1 = vpop.permute.xlu0 %1752 }
0x1d50   :  { %v1755_v17 = vmul.f32 %v2335_v16, %v1753_v1 }
0x1d52   :  { %2141 = vmatmul.mubr.msk.f32.vlgmr.msra.gmra.mxu0 %vm317_vm2, %v1755_v17 }
0x1d53   :  { %2159 = vmatpush3.msra.mxu0 %v1985_v24  ;;  %2174 = vmatprep.mubr.msk.f32.mxu0 %vm2378_vm3, %v2376_v3 }
0x1d54   :  { %2160 = vmatprep.subr.mxu0 %v2376_v3 }
0x1d55   :  { %2161 = vmatpush3.msra.mxu0 %v1984_v28 }
0x1d56   :  { %2162 = vmatprep.subr.mxu0 %v2376_v3 }
0x1d57   :  { %2163 = vmatpush3.msra.mxu0 %v1983_v48 }
0x1d58   :  { %2164 = vmatprep.subr.mxu0 %v2376_v3 }
0x1d59   :  { %2165 = vmatpush3.msra.mxu0 %v1982_v49 }
0x1d5a   :  { %2166 = vmatprep.subr.mxu0 %v2376_v3 }
0x1d5b   :  { %2167 = vmatpush3.msra.mxu0 %v1981_v29 }
0x1d5c   :  { %2168 = vmatprep.subr.mxu0 %v2376_v3 }
0x1d5d   :  { %2169 = vmatpush3.msra.mxu0 %v1980_v23 }
0x1d5e   :  { %2170 = vmatprep.subr.mxu0 %v2376_v3 }
0x1d5f   :  { %2171 = vmatpush3.msra.mxu0 %v1979_v25 }
0x1d60   :  { %2172 = vmatprep.subr.mxu0 %v2376_v3 }
0x1d61   :  { %2173 = vmatpush3.msra.mxu0 %v1978_v63 }
0x1e12   :  { %v1830_v40 = vpop.f32.mrf.mxu0 }
0x1e13   :  { %v1835_v41 = vadd.f32 %v1830_v40, %v256_v18 }
0x1e14   :  { %v1832_v34 = vpop.f32.mrf.mxu0 }
0x1e15   :  { %v1836_v35 = vadd.f32 %v1832_v34, %v258_v19  ;;  %v2142_v27 = vmul.f32 -1.442695, %v1835_v41 }
0x1e17   :  { %2336 = vtanh.f32 %v1836_v35  ;;  %v2143_v58 = vmul.f32 -1.442695, %v1836_v35 }
0x1e18   :  { %2338 = vpow2.f32 %v2142_v27 }
0x1e24   :  { %v2337_v31 = vpop.eup %2336 }
0x1e25   :  { %1852 = vrot.lane.b32.xlu1 %v2337_v31, %s2377_s10  ;;  %v2339_v7 = vpop.eup %2338 }
0x1e26   :  { %v1843_v9 = vadd.f32 1.0, %v2339_v7 }
0x1e28   :  { %2340 = vrcp.f32 %v1843_v9 }
0x1e35   :  { %v2341_v20 = vpop.eup %2340 }
0x1e36   :  { %v1850_v46 = vmul.f32 %v2341_v20, %v1749_v45 }
0x1e97   :  { %v1853_v21 = vpop.permute.xlu1 %1852 }
0x1e98   :  { %v1855_v22 = vmul.f32 %v2341_v20, %v1853_v21 }
0x1e9a   :  { %1857 = vrot.lane.b32.xlu0 %v1855_v22, %s2377_s10 }
0x1f0c   :  { %v1858_v33 = vpop.permute.xlu0 %1857 }
0x1f0d   :  { %v1860_v47 = vadd.f32 %v1858_v33, %v1850_v46 }
0x1f0f   :  { %2342 = vtanh.f32 %v1860_v47 }
0x1f10   :  { %2344 = vpow2.f32 %v2143_v58 }
0x1f1c   :  { %v2343_v57 = vpop.eup %2342 }
0x1f1d   :  { %1863 = vrot.lane.b32.xlu1 %v2343_v57, %s2377_s10  ;;  %v2345_v38 = vpop.eup %2344 }
0x1f1e   :  { %v1844_v59 = vadd.f32 1.0, %v2345_v38 }
0x1f20   :  { %2346 = vrcp.f32 %v1844_v59 }
0x1f2d   :  { %v2347_v39 = vpop.eup %2346 }
0x1f8f   :  { %v1864_v60 = vpop.permute.xlu1 %1863 }
0x1f90   :  { %v1866_v30 = vmul.f32 %v2347_v39, %v1864_v60 }
0x1f92   :  { %2144 = vmatmul.mubr.msk.f32.vlgmr.msra.gmra.mxu1 %vm317_vm2, %v1866_v30 }
0x2052   :  { %v1941_v62 = vpop.f32.mrf.mxu1 }
0x2053   :  { %v1946_v42 = vadd.f32 %v1941_v62, %v262_v61 }
0x2054   :  { %v1943_v4 = vpop.f32.mrf.mxu1 }
0x2055   :  { %v1947_v43 = vadd.f32 %v1943_v4, %v264_v2  ;;  %v2145_v6 = vmul.f32 -1.442695, %v1946_v42 }
0x2057   :  { %2348 = vtanh.f32 %v1947_v43  ;;  %v2146_v52 = vmul.f32 -1.442695, %v1947_v43 }
0x2058   :  { %2350 = vpow2.f32 %v2145_v6 }
0x2064   :  { %v2349_v5 = vpop.eup %2348 }
0x2065   :  { %1963 = vrot.lane.b32.xlu0 %v2349_v5, %s2377_s10  ;;  %v2351_v8 = vpop.eup %2350 }
0x2066   :  { %v1954_v36 = vadd.f32 1.0, %v2351_v8 }
0x2068   :  { %2352 = vrcp.f32 %v1954_v36 }
0x2075   :  { %v2353_v37 = vpop.eup %2352 }
0x2076   :  { %v1961_v26 = vmul.f32 %v2353_v37, %v1860_v47 }
0x20d7   :  { %v1964_v10 = vpop.permute.xlu0 %1963 }
0x20d8   :  { %v1966_v12 = vmul.f32 %v2353_v37, %v1964_v10 }
0x20da   :  { %1968 = vrot.lane.b32.xlu1 %v1966_v12, %s2377_s10 }
0x214c   :  { %v1969_v11 = vpop.permute.xlu1 %1968 }
0x214d   :  { %v1971_v50 = vadd.f32 %v1969_v11, %v1961_v26 }
0x214f   :  { %2354 = vtanh.f32 %v1971_v50 }
0x2150   :  { %2356 = vpow2.f32 %v2146_v52 }
0x215c   :  { %v2355_v51 = vpop.eup %2354 }
0x215d   :  { %1974 = vrot.lane.b32.xlu0 %v2355_v51, %s2377_s10  ;;  %v2357_v53 = vpop.eup %2356 }
0x215e   :  { %v1955_v0 = vadd.f32 1.0, %v2357_v53 }
0x2160   :  { %2358 = vrcp.f32 %v1955_v0 }
0x216d   :  { %v2359_v54 = vpop.eup %2358 }
0x21cf   :  { %v1975_v55 = vpop.permute.xlu0 %1974 }
0x21d0   :  { %v1977_v44 = vmul.f32 %v2359_v54, %v1975_v55 }
0x21d2   :  { %2175 = vmatmul.mubr.msk.f32.vlgmr.msra.gmra.mxu0 %vm317_vm2, %v1977_v44 }
0x2292   :  { %v2062_v45 = vpop.f32.mrf.mxu0 }
0x2293   :  { %v2063_v56 = vadd.f32 %v2147_v32, %v2062_v45 }
0x2294   :  { %v2176_v3 = vpop.f32.mrf.mxu0 }
0x2295   :  { %2066 = vst [vmem:[%s3128_s6] sm:$0xff] %v2063_v56 }

</bundles_post_ra>
